<compile_context>
chip_gen: v6e
topology: v6e:2x2x1
jax: 0.10.0
libtpu: 0.0.40
codegen_flags: <defaults>
</compile_context>

<pallas_src>
import functools
import math

import jax
import jax.numpy as jnp
import numpy as np
from jax.experimental import pallas as pl
from jax.experimental.pallas import tpu as pltpu


def lambda_init_fn(depth):
    return 0.8 - 0.6 * math.exp(-0.3 * depth)


# ---------------------------------------------------------------------------
# Generation-aware scoped-VMEM limit (~60% of physical, capped at 64 MiB:
# v5e/v6e -> 64 MiB, v7x (64 MiB physical) -> ~38 MiB).
# ---------------------------------------------------------------------------
def _vmem_limit_bytes():
    try:
        cap = int(pltpu.get_tpu_info().vmem_capacity_bytes)
    except Exception:  # non-TPU / interpret fallback
        cap = 128 * 1024 * 1024
    return min(int(cap * 0.6), 64 * 1024 * 1024)


# ---------------------------------------------------------------------------
# Tile-size helpers.  Block dims must be a multiple of the quantum OR equal
# the full array dim.
# ---------------------------------------------------------------------------
def _pick_tile(dim, target, quantum):
    """Largest multiple-of-`quantum` divisor of `dim` that is <= target, else dim."""
    if dim <= target:
        return dim
    best = None
    for t in range(quantum, target + 1, quantum):
        if dim % t == 0:
            best = t
    return best if best is not None else dim


def _pick_seq_tile(seq_len, target):
    # quantum 16: second-minor tile quantum for bf16-packed Q/K/V blocks.
    return _pick_tile(seq_len, target, 16)


def _pick_head_group(num_heads, head_dim, max_lanes=512):
    """Heads per attention grid step.  Need Hb*2*D % 128 == 0 (lane-dense output
    block) or Hb == num_heads (block covers the full feature dim E)."""
    two_d = 2 * head_dim
    valid = [hb for hb in range(1, num_heads + 1)
             if num_heads % hb == 0 and ((hb * two_d) % 128 == 0 or hb == num_heads)]
    small = [hb for hb in valid if hb * two_d <= max_lanes]
    if small:
        return max(small)
    # Guard: no lane-legal group fits the lane budget; take the smallest valid
    # one so per-step VMEM stays as small as the output constraint allows.
    return min(valid)


# ---------------------------------------------------------------------------
# Tiled matmul kernels for the linear projections:  out = x @ w,  w is (K, N).
# bf16 MXU inputs, f32 accumulation.
# ---------------------------------------------------------------------------
def _matmul_kernel_acc(x_ref, w_ref, o_ref, acc_ref):
    """Output narrower than f32: accumulate in f32 scratch, cast-store at the end."""
    @pl.when(pl.program_id(2) == 0)
    def _init():
        acc_ref[...] = jnp.zeros_like(acc_ref)

    acc_ref[...] += jnp.dot(x_ref[...].astype(jnp.bfloat16),
                            w_ref[...].astype(jnp.bfloat16),
                            preferred_element_type=jnp.float32)

    @pl.when(pl.program_id(2) == pl.num_programs(2) - 1)
    def _store():
        o_ref[...] = acc_ref[...].astype(o_ref.dtype)


def _matmul_kernel_f32out(x_ref, w_ref, o_ref):
    """f32 output: accumulate directly into the resident output block (no scratch)."""
    @pl.when(pl.program_id(2) == 0)
    def _init():
        o_ref[...] = jnp.zeros_like(o_ref)

    o_ref[...] += jnp.dot(x_ref[...].astype(jnp.bfloat16),
                          w_ref[...].astype(jnp.bfloat16),
                          preferred_element_type=jnp.float32)


def linear(x2d, w_kn, out_dtype=None):
    """x2d: (M, K); w_kn: (K, N) weight stored (in_features, out_features). No bias."""
    M, K = x2d.shape
    K2, N = w_kn.shape
    assert K == K2
    if out_dtype is None:
        out_dtype = x2d.dtype
    tm = _pick_tile(M, 512, 16)
    tn = _pick_tile(N, 512, 128)
    tk = _pick_tile(K, 512, 128)
    use_acc = np.dtype(out_dtype) != np.dtype(np.float32)
    kernel = _matmul_kernel_acc if use_acc else _matmul_kernel_f32out
    scratch = [pltpu.VMEM((tm, tn), jnp.float32)] if use_acc else []
    return pl.pallas_call(
        kernel,
        out_shape=jax.ShapeDtypeStruct((M, N), out_dtype),
        grid=(M // tm, N // tn, K // tk),
        in_specs=[
            pl.BlockSpec((tm, tk), lambda i, j, k: (i, k)),
            pl.BlockSpec((tk, tn), lambda i, j, k: (k, j)),
        ],
        out_specs=pl.BlockSpec((tm, tn), lambda i, j, k: (i, j)),
        scratch_shapes=scratch,
        compiler_params=pltpu.CompilerParams(
            dimension_semantics=("parallel", "parallel", "arbitrary"),
            vmem_limit_bytes=_vmem_limit_bytes(),
        ),
    )(x2d, w_kn)


# ---------------------------------------------------------------------------
# Flash-style differential attention kernel.
# Grid: (batch, head_group, q_tile, kv_tile), KV innermost / "arbitrary".
# Both differential components run in one batched online-softmax chain
# (2*Hb "heads"); the component split happens only in the epilogue.
# ---------------------------------------------------------------------------
def _diff_attn_kernel(lam_ref, q_ref, k_ref, v_ref, gain_ref, o_ref,
                      m_ref, l_ref, acc_ref, *, eps, sanitize_scores):
    kv_step = pl.program_id(3)

    @pl.when(kv_step == 0)
    def _init():
        m_ref[...] = jnp.full(m_ref.shape, -jnp.inf, jnp.float32)
        l_ref[...] = jnp.zeros(l_ref.shape, jnp.float32)
        acc_ref[...] = jnp.zeros(acc_ref.shape, jnp.float32)

    hb = q_ref.shape[1]
    tq = q_ref.shape[3]
    d = q_ref.shape[4]
    tk = k_ref.shape[3]
    two_d = v_ref.shape[3]

    # (Hb, 2, tq, D) -> (2*Hb, tq, D): leading-dim merge, layout-free.
    # q already carries the softmax scaling (folded into wq).
    q = q_ref[0].reshape(2 * hb, tq, d)      # bf16
    k = k_ref[0].reshape(2 * hb, tk, d)      # bf16
    v = v_ref[0]                             # (Hb, tk, 2D) bf16

    # Batched scores for both differential components in one MXU chain.
    s = jnp.einsum('gtd,gsd->gts', q, k,
                   preferred_element_type=jnp.float32)       # (2Hb, tq, tk) f32
    if sanitize_scores:
        s = jnp.nan_to_num(s)

    m_prev = m_ref[...]                                       # (2Hb, tq, 1)
    m_new = jnp.maximum(m_prev, jnp.max(s, axis=-1, keepdims=True))
    alpha = jnp.exp(m_prev - m_new)
    p = jnp.exp(s - m_new)                                    # (2Hb, tq, tk) f32
    l_ref[...] = alpha * l_ref[...] + jnp.sum(p, axis=-1, keepdims=True)

    # PV: both components of a head share the same V block -> fold the component
    # axis into the row dim of P (free leading-dim reshape) and run one batched
    # bf16 matmul per head.
    pv = jnp.einsum('hts,hsf->htf',
                    p.astype(v.dtype).reshape(hb, 2 * tq, tk), v,
                    preferred_element_type=jnp.float32)       # (Hb, 2*tq, 2D)
    acc_ref[...] = alpha * acc_ref[...] + pv.reshape(2 * hb, tq, two_d)
    m_ref[...] = m_new

    @pl.when(kv_step == pl.num_programs(3) - 1)
    def _finalize():
        lam = lam_ref[0, 0]                                   # SMEM scalar
        attn = acc_ref[...] * pl.reciprocal(l_ref[...], approx=True)  # (2Hb, tq, 2D)
        attn = attn.reshape(hb, 2, tq, two_d)
        attn = attn[:, 0] - lam * attn[:, 1]                  # (Hb, tq, 2D)
        # RMSNorm over the 2D feature dim; gain already includes (1 - lambda_init).
        ms = jnp.mean(attn * attn, axis=-1, keepdims=True)
        attn = attn * jax.lax.rsqrt(ms + eps) * gain_ref[...]
        attn = attn.astype(o_ref.dtype)
        # Pack heads lane-dense and do a single wide store into (tq, Hb*2D).
        if hb == 1:
            o_ref[0] = attn[0]
        else:
            o_ref[0] = jnp.concatenate([attn[h] for h in range(hb)], axis=-1)


# ---------------------------------------------------------------------------
# Full forward pass
# ---------------------------------------------------------------------------
def multihead_diff_attention(x, params, *, depth, num_heads, sanitize_scores=False):
    B, T, E = x.shape
    H = num_heads
    D = E // H // 2
    scaling = D ** (-0.5)
    lambda_init = lambda_init_fn(depth)

    # Fused Q|K|V projection weight (E, 3E), q columns pre-scaled, bf16 for the MXU.
    wqkv = jnp.concatenate(
        [params["wq"] * scaling, params["wk"], params["wv"]], axis=1
    ).astype(jnp.bfloat16)
    wo = params["wo"].astype(jnp.bfloat16)

    x2d = x.reshape(B * T, E)
    qkv = linear(x2d, wqkv, out_dtype=jnp.bfloat16)           # (B*T, 3E), one pass over x

    q = qkv[:, :E]
    k = qkv[:, E:2 * E]
    v = qkv[:, 2 * E:]

    # Layout for the attention kernel: component axis explicit for q/k so it can
    # live inside the block; v keeps its packed 2D feature dim.
    q5 = q.reshape(B, T, H, 2, D).transpose(0, 2, 3, 1, 4)    # (B, H, 2, T, D) bf16
    k5 = k.reshape(B, T, H, 2, D).transpose(0, 2, 3, 1, 4)    # (B, H, 2, T, D) bf16
    v4 = v.reshape(B, T, H, 2 * D).transpose(0, 2, 1, 3)      # (B, H, T, 2D)   bf16

    lambda_1 = jnp.exp(jnp.sum(params["lambda_q1"] * params["lambda_k1"]))
    lambda_2 = jnp.exp(jnp.sum(params["lambda_q2"] * params["lambda_k2"]))
    lam = (lambda_1 - lambda_2 + lambda_init).astype(jnp.float32).reshape(1, 1)

    # RMSNorm gain with the (1 - lambda_init) post-scale folded in.
    gain = (params["subln_weight"] * (1.0 - lambda_init)).reshape(1, 2 * D).astype(jnp.float32)

    Hb = _pick_head_group(H, D)          # heads per grid step (lane-dense output)
    G = H // Hb
    tq = _pick_seq_tile(T, 512)
    tk = _pick_seq_tile(T, 512)
    group_width = Hb * 2 * D

    kernel = functools.partial(_diff_attn_kernel, eps=1e-5,
                               sanitize_scores=sanitize_scores)

    attn = pl.pallas_call(
        kernel,
        out_shape=jax.ShapeDtypeStruct((B, T, E), jnp.bfloat16),
        # The three leading axes are "parallel"; B*G*(T/tq) >= 2 here so v7x's
        # two TensorCores both get work.
        grid=(B, G, T // tq, T // tk),
        in_specs=[
            # lambda_full: scalar in SMEM
            pl.BlockSpec(memory_space=pltpu.MemorySpace.SMEM),
            # q / k with the differential-component axis inside the block
            pl.BlockSpec((1, Hb, 2, tq, D), lambda b, g, qi, kv: (b, g, 0, qi, 0)),
            pl.BlockSpec((1, Hb, 2, tk, D), lambda b, g, qi, kv: (b, g, 0, kv, 0)),
            pl.BlockSpec((1, Hb, tk, 2 * D), lambda b, g, qi, kv: (b, g, kv, 0)),
            pl.BlockSpec((1, 2 * D), lambda b, g, qi, kv: (0, 0)),                  # rmsnorm gain
        ],
        # Lane-dense output written directly into (B, T, E): folds the
        # (B,H,T,2D)->(B,T,E) transpose into DMA addressing.
        out_specs=pl.BlockSpec((1, tq, group_width), lambda b, g, qi, kv: (b, qi, g)),
        scratch_shapes=[
            pltpu.VMEM((2 * Hb, tq, 1), jnp.float32),        # m (both components)
            pltpu.VMEM((2 * Hb, tq, 1), jnp.float32),        # l
            pltpu.VMEM((2 * Hb, tq, 2 * D), jnp.float32),    # acc
        ],
        compiler_params=pltpu.CompilerParams(
            dimension_semantics=("parallel", "parallel", "parallel", "arbitrary"),
            vmem_limit_bytes=_vmem_limit_bytes(),
        ),
    )(lam, q5, k5, v4, gain)

    out = linear(attn.reshape(B * T, E), wo, out_dtype=jnp.float32).reshape(B, T, E)
    # attn_drop / proj_drop are identity in eval mode (p=0.0)
    return out


# ---------------------------------------------------------------------------
# Pure-JAX f32 reference (mirrors the PyTorch forward) for a sanity check.
# ---------------------------------------------------------------------------
def _reference(x, params, *, depth, num_heads):
    B, T, E = x.shape
    H = num_heads
    D = E // H // 2
    scaling = D ** (-0.5)
    li = lambda_init_fn(depth)

    x2d = x.reshape(B * T, E)
    q = (x2d @ params["wq"]).reshape(B, T, 2 * H, D).transpose(0, 2, 1, 3) * scaling
    k = (x2d @ params["wk"]).reshape(B, T, 2 * H, D).transpose(0, 2, 1, 3)
    v = (x2d @ params["wv"]).reshape(B, T, H, 2 * D).transpose(0, 2, 1, 3)

    aw = jnp.einsum('bhtd,bhsd->bhts', q, k)
    aw = jax.nn.softmax(aw, axis=-1)
    l1 = jnp.exp(jnp.sum(params["lambda_q1"] * params["lambda_k1"]))
    l2 = jnp.exp(jnp.sum(params["lambda_q2"] * params["lambda_k2"]))
    lam = l1 - l2 + li
    aw = aw.reshape(B, H, 2, T, T)
    aw = aw[:, :, 0] - lam * aw[:, :, 1]
    attn = jnp.einsum('bhts,bhsd->bhtd', aw, v)
    ms = jnp.mean(attn * attn, axis=-1, keepdims=True)
    attn = attn * jax.lax.rsqrt(ms + 1e-5) * params["subln_weight"]
    attn = attn * (1.0 - li)
    attn = attn.transpose(0, 2, 1, 3).reshape(B, T, E)
    return (attn.reshape(B * T, E) @ params["wo"]).reshape(B, T, E)


# ---------------------------------------------------------------------------
# Deterministic parameter construction
# ---------------------------------------------------------------------------
def init_params(key, embed_dim, num_heads):
    head_dim = embed_dim // num_heads // 2
    ks = jax.random.split(key, 8)
    s = 1.0 / math.sqrt(embed_dim)
    return {
        # Linear weights stored pre-transposed as (in_features, out_features).
        "wq": jax.random.normal(ks[0], (embed_dim, embed_dim), jnp.float32) * s,
        "wk": jax.random.normal(ks[1], (embed_dim, embed_dim), jnp.float32) * s,
        "wv": jax.random.normal(ks[2], (embed_dim, embed_dim), jnp.float32) * s,
        "wo": jax.random.normal(ks[3], (embed_dim, embed_dim), jnp.float32) * s,
        "lambda_q1": jax.random.normal(ks[4], (head_dim,), jnp.float32) * 0.1,
        "lambda_k1": jax.random.normal(ks[5], (head_dim,), jnp.float32) * 0.1,
        "lambda_q2": jax.random.normal(ks[6], (head_dim,), jnp.float32) * 0.1,
        "lambda_k2": jax.random.normal(ks[7], (head_dim,), jnp.float32) * 0.1,
        "subln_weight": jnp.ones((2 * head_dim,), jnp.float32),
    }


if __name__ == "__main__":
    # small shapes: batch=2, seq=16, embed_dim=64, num_heads=4 -> head_dim=8
    B, T, E, H = 2, 16, 64, 4
    depth = 2

    key = jax.random.PRNGKey(0)
    kx, kp = jax.random.split(key)
    x = jax.random.normal(kx, (B, T, E), jnp.float32)
    params = init_params(kp, E, H)

    fwd = jax.jit(functools.partial(multihead_diff_attention, depth=depth, num_heads=H))
    out = jax.block_until_ready(fwd(x, params))
    assert out.shape == (B, T, E)

    ref = jax.block_until_ready(_reference(x, params, depth=depth, num_heads=H))
    max_err = float(jnp.max(jnp.abs(out - ref)))
    # bf16 MXU inputs with f32 accumulation -> relaxed tolerance vs the f32 reference.
    assert jnp.allclose(out, ref, rtol=5e-2, atol=5e-2), f"max abs err {max_err}"
    print("KERNEL_OK")
</pallas_src>

<mosaic_0001>
module attributes {stable_mosaic.version = 11 : i64} {
  func.func @_matmul_kernel_acc(%arg0: i32, %arg1: i32, %arg2: i32, %arg3: memref<32x64xf32, #tpu.memory_space<vmem>>, %arg4: memref<64x192xbf16, #tpu.memory_space<vmem>>, %arg5: memref<32x192xbf16, #tpu.memory_space<vmem>>, %arg6: memref<32x192xf32, #tpu.memory_space<vmem>>) attributes {dimension_semantics = [#tpu.dimension_semantics<parallel>, #tpu.dimension_semantics<parallel>, #tpu.dimension_semantics<arbitrary>], iteration_bounds = array<i64: 1, 1, 1>, scalar_prefetch = 0 : i64, scratch_operands = 1 : i64, tpu.core_type = #tpu.core_type<tc>, window_params = [{transform_indices = @transform_0, window_bounds = array<i64: 32, 64>}, {transform_indices = @transform_1, window_bounds = array<i64: 64, 192>}, {transform_indices = @transform_2, window_bounds = array<i64: 32, 192>}]} {
    %c0_i32 = arith.constant 0 : i32
    %0 = arith.cmpi eq, %arg2, %c0_i32 : i32
    %1 = arith.extui %0 : i1 to i32
    %c0_i32_0 = arith.constant 0 : i32
    %2 = arith.cmpi ne, %1, %c0_i32_0 : i32
    scf.if %2 {
      %cst_10 = arith.constant 0.000000e+00 : f32
      %13 = vector.broadcast %cst_10 : f32 to vector<32x192xf32>
      %c0_11 = arith.constant 0 : index
      %c0_12 = arith.constant 0 : index
      %14 = vector.load %arg6[%c0_11, %c0_12] : memref<32x192xf32, #tpu.memory_space<vmem>>, vector<32x192xf32>
      tpu.vector_store %arg6[%c0_11, %c0_12], %13 {strides = array<i32>} : memref<32x192xf32, #tpu.memory_space<vmem>>, vector<32x192xf32>,
    } else {
    }
    %c0 = arith.constant 0 : index
    %c0_1 = arith.constant 0 : index
    %3 = vector.load %arg6[%c0, %c0_1] : memref<32x192xf32, #tpu.memory_space<vmem>>, vector<32x192xf32>
    %c0_2 = arith.constant 0 : index
    %c0_3 = arith.constant 0 : index
    %4 = vector.load %arg3[%c0_2, %c0_3] : memref<32x64xf32, #tpu.memory_space<vmem>>, vector<32x64xf32>
    %5 = arith.truncf %4 : vector<32x64xf32> to vector<32x64xbf16>
    %c0_4 = arith.constant 0 : index
    %c0_5 = arith.constant 0 : index
    %6 = vector.load %arg4[%c0_4, %c0_5] : memref<64x192xbf16, #tpu.memory_space<vmem>>, vector<64x192xbf16>
    %cst = arith.constant dense<0.000000e+00> : vector<32x192xf32>
    %7 = tpu.matmul %5, %6, %cst {dimension_numbers = #tpu.dot_dimension_numbers<[1], [0], [0], [1], [0, 0, 1, 1], [], []>} : vector<32x64xbf16>, vector<64x192xbf16>, vector<32x192xf32> -> vector<32x192xf32>
    %8 = arith.addf %3, %7 : vector<32x192xf32>
    %c0_6 = arith.constant 0 : index
    %c0_7 = arith.constant 0 : index
    %9 = vector.load %arg6[%c0_6, %c0_7] : memref<32x192xf32, #tpu.memory_space<vmem>>, vector<32x192xf32>
    tpu.vector_store %arg6[%c0_6, %c0_7], %8 {strides = array<i32>} : memref<32x192xf32, #tpu.memory_space<vmem>>, vector<32x192xf32>,
    %c0_i32_8 = arith.constant 0 : i32
    %10 = arith.cmpi eq, %arg2, %c0_i32_8 : i32
    %11 = arith.extui %10 : i1 to i32
    %c0_i32_9 = arith.constant 0 : i32
    %12 = arith.cmpi ne, %11, %c0_i32_9 : i32
    scf.if %12 {
      %c0_10 = arith.constant 0 : index
      %c0_11 = arith.constant 0 : index
      %13 = vector.load %arg6[%c0_10, %c0_11] : memref<32x192xf32, #tpu.memory_space<vmem>>, vector<32x192xf32>
      %14 = arith.truncf %13 : vector<32x192xf32> to vector<32x192xbf16>
      %c0_12 = arith.constant 0 : index
      %c0_13 = arith.constant 0 : index
      %15 = vector.load %arg5[%c0_12, %c0_13] : memref<32x192xbf16, #tpu.memory_space<vmem>>, vector<32x192xbf16>
      tpu.vector_store %arg5[%c0_12, %c0_13], %14 {strides = array<i32>} : memref<32x192xbf16, #tpu.memory_space<vmem>>, vector<32x192xbf16>,
    } else {
    }
    return
  }
  func.func @transform_0(%arg0: i32, %arg1: i32, %arg2: i32) -> (i32, i32) {
    %c0_i32 = arith.constant 0 : i32
    return %arg0, %arg2 : i32, i32
  }
  func.func @transform_1(%arg0: i32, %arg1: i32, %arg2: i32) -> (i32, i32) {
    %c0_i32 = arith.constant 0 : i32
    return %arg2, %arg1 : i32, i32
  }
  func.func @transform_2(%arg0: i32, %arg1: i32, %arg2: i32) -> (i32, i32) {
    %c0_i32 = arith.constant 0 : i32
    return %arg0, %arg1 : i32, i32
  }
}

module attributes {stable_mosaic.version = 11 : i64} {
  func.func @_matmul_kernel_f32out(%arg0: i32, %arg1: i32, %arg2: i32, %arg3: memref<32x64xbf16, #tpu.memory_space<vmem>>, %arg4: memref<64x64xbf16, #tpu.memory_space<vmem>>, %arg5: memref<32x64xf32, #tpu.memory_space<vmem>>) attributes {dimension_semantics = [#tpu.dimension_semantics<parallel>, #tpu.dimension_semantics<parallel>, #tpu.dimension_semantics<arbitrary>], iteration_bounds = array<i64: 1, 1, 1>, scalar_prefetch = 0 : i64, scratch_operands = 0 : i64, tpu.core_type = #tpu.core_type<tc>, window_params = [{transform_indices = @transform_0, window_bounds = array<i64: 32, 64>}, {transform_indices = @transform_1, window_bounds = array<i64: 64, 64>}, {transform_indices = @transform_2, window_bounds = array<i64: 32, 64>}]} {
    %c0_i32 = arith.constant 0 : i32
    %0 = arith.cmpi eq, %arg2, %c0_i32 : i32
    %1 = arith.extui %0 : i1 to i32
    %c0_i32_0 = arith.constant 0 : i32
    %2 = arith.cmpi ne, %1, %c0_i32_0 : i32
    scf.if %2 {
      %cst_8 = arith.constant 0.000000e+00 : f32
      %9 = vector.broadcast %cst_8 : f32 to vector<32x64xf32>
      %c0_9 = arith.constant 0 : index
      %c0_10 = arith.constant 0 : index
      %10 = vector.load %arg5[%c0_9, %c0_10] : memref<32x64xf32, #tpu.memory_space<vmem>>, vector<32x64xf32>
      tpu.vector_store %arg5[%c0_9, %c0_10], %9 {strides = array<i32>} : memref<32x64xf32, #tpu.memory_space<vmem>>, vector<32x64xf32>,
    } else {
    }
    %c0 = arith.constant 0 : index
    %c0_1 = arith.constant 0 : index
    %3 = vector.load %arg5[%c0, %c0_1] : memref<32x64xf32, #tpu.memory_space<vmem>>, vector<32x64xf32>
    %c0_2 = arith.constant 0 : index
    %c0_3 = arith.constant 0 : index
    %4 = vector.load %arg3[%c0_2, %c0_3] : memref<32x64xbf16, #tpu.memory_space<vmem>>, vector<32x64xbf16>
    %c0_4 = arith.constant 0 : index
    %c0_5 = arith.constant 0 : index
    %5 = vector.load %arg4[%c0_4, %c0_5] : memref<64x64xbf16, #tpu.memory_space<vmem>>, vector<64x64xbf16>
    %cst = arith.constant dense<0.000000e+00> : vector<32x64xf32>
    %6 = tpu.matmul %4, %5, %cst {dimension_numbers = #tpu.dot_dimension_numbers<[1], [0], [0], [1], [0, 0, 1, 1], [], []>} : vector<32x64xbf16>, vector<64x64xbf16>, vector<32x64xf32> -> vector<32x64xf32>
    %7 = arith.addf %3, %6 : vector<32x64xf32>
    %c0_6 = arith.constant 0 : index
    %c0_7 = arith.constant 0 : index
    %8 = vector.load %arg5[%c0_6, %c0_7] : memref<32x64xf32, #tpu.memory_space<vmem>>, vector<32x64xf32>
    tpu.vector_store %arg5[%c0_6, %c0_7], %7 {strides = array<i32>} : memref<32x64xf32, #tpu.memory_space<vmem>>, vector<32x64xf32>,
    return
  }
  func.func @transform_0(%arg0: i32, %arg1: i32, %arg2: i32) -> (i32, i32) {
    %c0_i32 = arith.constant 0 : i32
    return %arg0, %arg2 : i32, i32
  }
  func.func @transform_1(%arg0: i32, %arg1: i32, %arg2: i32) -> (i32, i32) {
    %c0_i32 = arith.constant 0 : i32
    return %arg2, %arg1 : i32, i32
  }
  func.func @transform_2(%arg0: i32, %arg1: i32, %arg2: i32) -> (i32, i32) {
    %c0_i32 = arith.constant 0 : i32
    return %arg0, %arg1 : i32, i32
  }
}

module attributes {stable_mosaic.version = 11 : i64} {
  func.func @_diff_attn_kernel(%arg0: i32, %arg1: i32, %arg2: i32, %arg3: i32, %arg4: memref<1x1xf32, #tpu.memory_space<smem>>, %arg5: memref<1x4x2x16x8xbf16, #tpu.memory_space<vmem>>, %arg6: memref<1x4x2x16x8xbf16, #tpu.memory_space<vmem>>, %arg7: memref<1x4x16x16xbf16, #tpu.memory_space<vmem>>, %arg8: memref<1x16xf32, #tpu.memory_space<vmem>>, %arg9: memref<1x16x64xbf16, #tpu.memory_space<vmem>>, %arg10: memref<8x16x1xf32, #tpu.memory_space<vmem>>, %arg11: memref<8x16x1xf32, #tpu.memory_space<vmem>>, %arg12: memref<8x16x16xf32, #tpu.memory_space<vmem>>) attributes {dimension_semantics = [#tpu.dimension_semantics<parallel>, #tpu.dimension_semantics<parallel>, #tpu.dimension_semantics<parallel>, #tpu.dimension_semantics<arbitrary>], iteration_bounds = array<i64: 2, 1, 1, 1>, scalar_prefetch = 0 : i64, scratch_operands = 3 : i64, tpu.core_type = #tpu.core_type<tc>, window_params = [{transform_indices = @transform_0, window_bounds = array<i64: 1, 1>}, {transform_indices = @transform_1, window_bounds = array<i64: 1, 4, 2, 16, 8>}, {transform_indices = @transform_2, window_bounds = array<i64: 1, 4, 2, 16, 8>}, {transform_indices = @transform_3, window_bounds = array<i64: 1, 4, 16, 16>}, {pipeline_mode = #tpu.pipeline_mode<synchronous>, transform_indices = @transform_4, window_bounds = array<i64: 1, 16>}, {transform_indices = @transform_5, window_bounds = array<i64: 1, 16, 64>}]} {
    %c0_i32 = arith.constant 0 : i32
    %0 = arith.cmpi eq, %arg3, %c0_i32 : i32
    %1 = arith.extui %0 : i1 to i32
    %c0_i32_0 = arith.constant 0 : i32
    %2 = arith.cmpi ne, %1, %c0_i32_0 : i32
    scf.if %2 {
      %cst_37 = arith.constant 0xFF800000 : f32
      %40 = vector.broadcast %cst_37 : f32 to vector<8x16x1xf32>
      %c0_38 = arith.constant 0 : index
      %c0_39 = arith.constant 0 : index
      %c0_40 = arith.constant 0 : index
      %41 = vector.load %arg10[%c0_38, %c0_39, %c0_40] : memref<8x16x1xf32, #tpu.memory_space<vmem>>, vector<8x16x1xf32>
      tpu.vector_store %arg10[%c0_38, %c0_39, %c0_40], %40 {strides = array<i32>} : memref<8x16x1xf32, #tpu.memory_space<vmem>>, vector<8x16x1xf32>,
      %cst_41 = arith.constant 0.000000e+00 : f32
      %42 = vector.broadcast %cst_41 : f32 to vector<8x16x1xf32>
      %c0_42 = arith.constant 0 : index
      %c0_43 = arith.constant 0 : index
      %c0_44 = arith.constant 0 : index
      %43 = vector.load %arg11[%c0_42, %c0_43, %c0_44] : memref<8x16x1xf32, #tpu.memory_space<vmem>>, vector<8x16x1xf32>
      tpu.vector_store %arg11[%c0_42, %c0_43, %c0_44], %42 {strides = array<i32>} : memref<8x16x1xf32, #tpu.memory_space<vmem>>, vector<8x16x1xf32>,
      %cst_45 = arith.constant 0.000000e+00 : f32
      %44 = vector.broadcast %cst_45 : f32 to vector<8x16x16xf32>
      %c0_46 = arith.constant 0 : index
      %c0_47 = arith.constant 0 : index
      %c0_48 = arith.constant 0 : index
      %45 = vector.load %arg12[%c0_46, %c0_47, %c0_48] : memref<8x16x16xf32, #tpu.memory_space<vmem>>, vector<8x16x16xf32>
      tpu.vector_store %arg12[%c0_46, %c0_47, %c0_48], %44 {strides = array<i32>} : memref<8x16x16xf32, #tpu.memory_space<vmem>>, vector<8x16x16xf32>,
    } else {
    }
    %c0 = arith.constant 0 : index
    %c0_1 = arith.constant 0 : index
    %c0_2 = arith.constant 0 : index
    %c0_3 = arith.constant 0 : index
    %c0_4 = arith.constant 0 : index
    %3 = vector.load %arg5[%c0, %c0_1, %c0_2, %c0_3, %c0_4] : memref<1x4x2x16x8xbf16, #tpu.memory_space<vmem>>, vector<1x4x2x16x8xbf16>
    %4 = vector.shape_cast %3 : vector<1x4x2x16x8xbf16> to vector<4x2x16x8xbf16>
    %5 = vector.shape_cast %4 : vector<4x2x16x8xbf16> to vector<8x16x8xbf16>
    %c0_5 = arith.constant 0 : index
    %c0_6 = arith.constant 0 : index
    %c0_7 = arith.constant 0 : index
    %c0_8 = arith.constant 0 : index
    %c0_9 = arith.constant 0 : index
    %6 = vector.load %arg6[%c0_5, %c0_6, %c0_7, %c0_8, %c0_9] : memref<1x4x2x16x8xbf16, #tpu.memory_space<vmem>>, vector<1x4x2x16x8xbf16>
    %7 = vector.shape_cast %6 : vector<1x4x2x16x8xbf16> to vector<4x2x16x8xbf16>
    %8 = vector.shape_cast %7 : vector<4x2x16x8xbf16> to vector<8x16x8xbf16>
    %c0_10 = arith.constant 0 : index
    %c0_11 = arith.constant 0 : index
    %c0_12 = arith.constant 0 : index
    %c0_13 = arith.constant 0 : index
    %9 = vector.load %arg7[%c0_10, %c0_11, %c0_12, %c0_13] : memref<1x4x16x16xbf16, #tpu.memory_space<vmem>>, vector<1x4x16x16xbf16>
    %10 = vector.shape_cast %9 : vector<1x4x16x16xbf16> to vector<4x16x16xbf16>
    "tpu.trace_start"() <{level = 10 : i32, message = "gtd,gsd->gts"}> : () -> ()
    %cst = arith.constant dense<0.000000e+00> : vector<8x16x16xf32>
    %11 = tpu.matmul %5, %8, %cst {dimension_numbers = #tpu.dot_dimension_numbers<[2], [2], [1], [1], [0, 0, 0, 1, 1, 1], [0], [0]>} : vector<8x16x8xbf16>, vector<8x16x8xbf16>, vector<8x16x16xf32> -> vector<8x16x16xf32>
    "tpu.trace_stop"() : () -> ()
    %c0_14 = arith.constant 0 : index
    %c0_15 = arith.constant 0 : index
    %c0_16 = arith.constant 0 : index
    %12 = vector.load %arg10[%c0_14, %c0_15, %c0_16] : memref<8x16x1xf32, #tpu.memory_space<vmem>>, vector<8x16x1xf32>
    %cst_17 = arith.constant dense<0xFF800000> : vector<8x16xf32>
    %13 = vector.multi_reduction <maximumf>, %11, %cst_17 [2] : vector<8x16x16xf32> to vector<8x16xf32>
    %14 = vector.shape_cast %13 : vector<8x16xf32> to vector<8x16x1xf32>
    %15 = arith.maximumf %12, %14 : vector<8x16x1xf32>
    %16 = arith.subf %12, %15 : vector<8x16x1xf32>
    %17 = math.exp %16 : vector<8x16x1xf32>
    %18 = vector.broadcast %15 : vector<8x16x1xf32> to vector<8x16x16xf32>
    %19 = arith.subf %11, %18 : vector<8x16x16xf32>
    %20 = math.exp %19 : vector<8x16x16xf32>
    %c0_18 = arith.constant 0 : index
    %c0_19 = arith.constant 0 : index
    %c0_20 = arith.constant 0 : index
    %21 = vector.load %arg11[%c0_18, %c0_19, %c0_20] : memref<8x16x1xf32, #tpu.memory_space<vmem>>, vector<8x16x1xf32>
    %22 = arith.mulf %17, %21 : vector<8x16x1xf32>
    %cst_21 = arith.constant dense<0.000000e+00> : vector<8x16xf32>
    %23 = vector.multi_reduction <add>, %20, %cst_21 [2] : vector<8x16x16xf32> to vector<8x16xf32>
    %24 = vector.shape_cast %23 : vector<8x16xf32> to vector<8x16x1xf32>
    %25 = arith.addf %22, %24 : vector<8x16x1xf32>
    %c0_22 = arith.constant 0 : index
    %c0_23 = arith.constant 0 : index
    %c0_24 = arith.constant 0 : index
    %26 = vector.load %arg11[%c0_22, %c0_23, %c0_24] : memref<8x16x1xf32, #tpu.memory_space<vmem>>, vector<8x16x1xf32>
    tpu.vector_store %arg11[%c0_22, %c0_23, %c0_24], %25 {strides = array<i32>} : memref<8x16x1xf32, #tpu.memory_space<vmem>>, vector<8x16x1xf32>,
    %27 = arith.truncf %20 : vector<8x16x16xf32> to vector<8x16x16xbf16>
    %28 = vector.shape_cast %27 : vector<8x16x16xbf16> to vector<4x32x16xbf16>
    "tpu.trace_start"() <{level = 10 : i32, message = "hts,hsf->htf"}> : () -> ()
    %cst_25 = arith.constant dense<0.000000e+00> : vector<4x32x16xf32>
    %29 = tpu.matmul %28, %10, %cst_25 {dimension_numbers = #tpu.dot_dimension_numbers<[2], [1], [1], [2], [0, 0, 0, 1, 1, 2], [0], [0]>} : vector<4x32x16xbf16>, vector<4x16x16xbf16>, vector<4x32x16xf32> -> vector<4x32x16xf32>
    "tpu.trace_stop"() : () -> ()
    %c0_26 = arith.constant 0 : index
    %c0_27 = arith.constant 0 : index
    %c0_28 = arith.constant 0 : index
    %30 = vector.load %arg12[%c0_26, %c0_27, %c0_28] : memref<8x16x16xf32, #tpu.memory_space<vmem>>, vector<8x16x16xf32>
    %31 = vector.broadcast %17 : vector<8x16x1xf32> to vector<8x16x16xf32>
    %32 = arith.mulf %31, %30 : vector<8x16x16xf32>
    %33 = vector.shape_cast %29 : vector<4x32x16xf32> to vector<8x16x16xf32>
    %34 = arith.addf %32, %33 : vector<8x16x16xf32>
    %c0_29 = arith.constant 0 : index
    %c0_30 = arith.constant 0 : index
    %c0_31 = arith.constant 0 : index
    %35 = vector.load %arg12[%c0_29, %c0_30, %c0_31] : memref<8x16x16xf32, #tpu.memory_space<vmem>>, vector<8x16x16xf32>
    tpu.vector_store %arg12[%c0_29, %c0_30, %c0_31], %34 {strides = array<i32>} : memref<8x16x16xf32, #tpu.memory_space<vmem>>, vector<8x16x16xf32>,
    %c0_32 = arith.constant 0 : index
    %c0_33 = arith.constant 0 : index
    %c0_34 = arith.constant 0 : index
    %36 = vector.load %arg10[%c0_32, %c0_33, %c0_34] : memref<8x16x1xf32, #tpu.memory_space<vmem>>, vector<8x16x1xf32>
    tpu.vector_store %arg10[%c0_32, %c0_33, %c0_34], %15 {strides = array<i32>} : memref<8x16x1xf32, #tpu.memory_space<vmem>>, vector<8x16x1xf32>,
    %c0_i32_35 = arith.constant 0 : i32
    %37 = arith.cmpi eq, %arg3, %c0_i32_35 : i32
    %38 = arith.extui %37 : i1 to i32
    %c0_i32_36 = arith.constant 0 : i32
    %39 = arith.cmpi ne, %38, %c0_i32_36 : i32
    scf.if %39 {
      %c0_37 = arith.constant 0 : index
      %c0_38 = arith.constant 0 : index
      %40 = memref.load %arg4[%c0_37, %c0_38] : memref<1x1xf32, #tpu.memory_space<smem>>
      %c0_39 = arith.constant 0 : index
      %c0_40 = arith.constant 0 : index
      %c0_41 = arith.constant 0 : index
      %41 = vector.load %arg12[%c0_39, %c0_40, %c0_41] : memref<8x16x16xf32, #tpu.memory_space<vmem>>, vector<8x16x16xf32>
      %c0_42 = arith.constant 0 : index
      %c0_43 = arith.constant 0 : index
      %c0_44 = arith.constant 0 : index
      %42 = vector.load %arg11[%c0_42, %c0_43, %c0_44] : memref<8x16x1xf32, #tpu.memory_space<vmem>>, vector<8x16x1xf32>
      %43 = tpu.reciprocal %42 {approx = true} : vector<8x16x1xf32> -> vector<8x16x1xf32>
      %44 = vector.broadcast %43 : vector<8x16x1xf32> to vector<8x16x16xf32>
      %45 = arith.mulf %41, %44 : vector<8x16x16xf32>
      %46 = vector.shape_cast %45 : vector<8x16x16xf32> to vector<4x2x16x16xf32>
      %47 = vector.extract_strided_slice %46 {offsets = [0, 0, 0, 0], sizes = [4, 1, 16, 16], strides = [1, 1, 1, 1]} : vector<4x2x16x16xf32> to vector<4x1x16x16xf32>
      %48 = vector.shape_cast %47 : vector<4x1x16x16xf32> to vector<4x16x16xf32>
      %49 = vector.extract_strided_slice %46 {offsets = [0, 1, 0, 0], sizes = [4, 1, 16, 16], strides = [1, 1, 1, 1]} : vector<4x2x16x16xf32> to vector<4x1x16x16xf32>
      %50 = vector.shape_cast %49 : vector<4x1x16x16xf32> to vector<4x16x16xf32>
      %51 = vector.broadcast %40 : f32 to vector<4x16x16xf32>
      %52 = arith.mulf %51, %50 : vector<4x16x16xf32>
      %53 = arith.subf %48, %52 : vector<4x16x16xf32>
      %54 = arith.mulf %53, %53 : vector<4x16x16xf32>
      %cst_45 = arith.constant dense<0.000000e+00> : vector<4x16xf32>
      %55 = vector.multi_reduction <add>, %54, %cst_45 [2] : vector<4x16x16xf32> to vector<4x16xf32>
      %56 = vector.shape_cast %55 : vector<4x16xf32> to vector<4x16x1xf32>
      %cst_46 = arith.constant 1.600000e+01 : f32
      %57 = vector.broadcast %cst_46 : f32 to vector<4x16x1xf32>
      %58 = arith.divf %56, %57 : vector<4x16x1xf32>
      %cst_47 = arith.constant 9.99999974E-6 : f32
      %59 = vector.broadcast %cst_47 : f32 to vector<4x16x1xf32>
      %60 = arith.addf %58, %59 : vector<4x16x1xf32>
      %61 = math.rsqrt %60 : vector<4x16x1xf32>
      %62 = vector.broadcast %61 : vector<4x16x1xf32> to vector<4x16x16xf32>
      %63 = arith.mulf %53, %62 : vector<4x16x16xf32>
      %c0_48 = arith.constant 0 : index
      %c0_49 = arith.constant 0 : index
      %64 = vector.load %arg8[%c0_48, %c0_49] : memref<1x16xf32, #tpu.memory_space<vmem>>, vector<1x16xf32>
      %65 = vector.shape_cast %64 : vector<1x16xf32> to vector<1x1x16xf32>
      %66 = vector.broadcast %65 : vector<1x1x16xf32> to vector<4x16x16xf32>
      %67 = arith.mulf %63, %66 : vector<4x16x16xf32>
      %68 = arith.truncf %67 : vector<4x16x16xf32> to vector<4x16x16xbf16>
      %69 = vector.extract_strided_slice %68 {offsets = [0, 0, 0], sizes = [1, 16, 16], strides = [1, 1, 1]} : vector<4x16x16xbf16> to vector<1x16x16xbf16>
      %70 = vector.shape_cast %69 : vector<1x16x16xbf16> to vector<16x16xbf16>
      %71 = vector.extract_strided_slice %68 {offsets = [1, 0, 0], sizes = [1, 16, 16], strides = [1, 1, 1]} : vector<4x16x16xbf16> to vector<1x16x16xbf16>
      %72 = vector.shape_cast %71 : vector<1x16x16xbf16> to vector<16x16xbf16>
      %73 = vector.extract_strided_slice %68 {offsets = [2, 0, 0], sizes = [1, 16, 16], strides = [1, 1, 1]} : vector<4x16x16xbf16> to vector<1x16x16xbf16>
      %74 = vector.shape_cast %73 : vector<1x16x16xbf16> to vector<16x16xbf16>
      %75 = vector.extract_strided_slice %68 {offsets = [3, 0, 0], sizes = [1, 16, 16], strides = [1, 1, 1]} : vector<4x16x16xbf16> to vector<1x16x16xbf16>
      %76 = vector.shape_cast %75 : vector<1x16x16xbf16> to vector<16x16xbf16>
      %77 = tpu.concatenate %70, %72, %74, %76 in 1 : vector<16x16xbf16>, vector<16x16xbf16>, vector<16x16xbf16>, vector<16x16xbf16> -> vector<16x64xbf16>
      %c0_50 = arith.constant 0 : index
      %c0_51 = arith.constant 0 : index
      %c0_52 = arith.constant 0 : index
      %78 = vector.load %arg9[%c0_50, %c0_51, %c0_52] : memref<1x16x64xbf16, #tpu.memory_space<vmem>>, vector<1x16x64xbf16>
      %79 = vector.shape_cast %78 : vector<1x16x64xbf16> to vector<16x64xbf16>
      %80 = vector.shape_cast %77 : vector<16x64xbf16> to vector<1x16x64xbf16>
      tpu.vector_store %arg9[%c0_50, %c0_51, %c0_52], %80 {strides = array<i32>} : memref<1x16x64xbf16, #tpu.memory_space<vmem>>, vector<1x16x64xbf16>,
    } else {
    }
    return
  }
  func.func @transform_0(%arg0: i32, %arg1: i32, %arg2: i32, %arg3: i32) -> (i32, i32) {
    %c0_i32 = arith.constant 0 : i32
    %c0_i32_0 = arith.constant 0 : i32
    %c0_i32_1 = arith.constant 0 : i32
    return %c0_i32, %c0_i32_0 : i32, i32
  }
  func.func @transform_1(%arg0: i32, %arg1: i32, %arg2: i32, %arg3: i32) -> (i32, i32, i32, i32, i32) {
    %c0_i32 = arith.constant 0 : i32
    %c0_i32_0 = arith.constant 0 : i32
    %c0_i32_1 = arith.constant 0 : i32
    return %arg0, %arg1, %c0_i32, %arg2, %c0_i32_0 : i32, i32, i32, i32, i32
  }
  func.func @transform_2(%arg0: i32, %arg1: i32, %arg2: i32, %arg3: i32) -> (i32, i32, i32, i32, i32) {
    %c0_i32 = arith.constant 0 : i32
    %c0_i32_0 = arith.constant 0 : i32
    %c0_i32_1 = arith.constant 0 : i32
    return %arg0, %arg1, %c0_i32, %arg3, %c0_i32_0 : i32, i32, i32, i32, i32
  }
  func.func @transform_3(%arg0: i32, %arg1: i32, %arg2: i32, %arg3: i32) -> (i32, i32, i32, i32) {
    %c0_i32 = arith.constant 0 : i32
    %c0_i32_0 = arith.constant 0 : i32
    return %arg0, %arg1, %arg3, %c0_i32 : i32, i32, i32, i32
  }
  func.func @transform_4(%arg0: i32, %arg1: i32, %arg2: i32, %arg3: i32) -> (i32, i32) {
    %c0_i32 = arith.constant 0 : i32
    %c0_i32_0 = arith.constant 0 : i32
    %c0_i32_1 = arith.constant 0 : i32
    return %c0_i32, %c0_i32_0 : i32, i32
  }
  func.func @transform_5(%arg0: i32, %arg1: i32, %arg2: i32, %arg3: i32) -> (i32, i32, i32) {
    %c0_i32 = arith.constant 0 : i32
    return %arg0, %arg2, %arg1 : i32, i32, i32
  }
}

</mosaic_0001>

<bundles_post_ra>
// kernel: multihead_diff_attention.3
= control target key start
LH: loop header
LB: loop body
LE: loop exit
PB: predicated region body
PF: predicated region fallthrough
CT: control target
= control target key end

     0   :  { %vm17_vm0 = vcmask 523264   ;;  %v249_v1 = vmov 0   ;;  %v250_v2 = vmov 0.0   ;;  %vm198_vm1 = vcmask 1043456   ;;  %s324_s1 = inlined_call_operand.vmem [shape: bf16[64,192], index: 1, kind: input, shape index: {}]   ;;  %s325_s0 = inlined_call_operand.vmem [shape: f32[32,64], index: 0, kind: input, shape index: {}]   ;;  %s326_s2 = inlined_call_operand.vmem [shape: bf16[32,192], index: 2, kind: output, shape index: {}]  }
   0x1   :  { %v237_v0 = vld [vmem:[%s324_s1 + $0x34] ss:$8 sps:$4 sm:$0xff]   ;;  %126 = vmatprep.mubr.bf16.mxu0 %v249_v1  ;;  %136 = vmatprep.mubr.bf16.mxu1 %v249_v1  ;;  %18 = vst.msk [vmem:[#allocation2 + $0x8] sm:$0xff] %vm17_vm0, %v250_v2  ;;  %20 = vst.msk [vmem:[#allocation2 + $0x18] sm:$0xff] %vm17_vm0, %v250_v2  ;;  %v239_v3 = vld [vmem:[%s324_s1 + $0x30] ss:$8 sps:$4 sm:$0xff]  }
   0x2   :  { %22 = vst.msk [vmem:[#allocation2 + $0x28] sm:$0xff] %vm17_vm0, %v250_v2  ;;  %24 = vst.msk [vmem:[#allocation2 + $0x38] sm:$0xff] %vm17_vm0, %v250_v2  ;;  %102 = vmatprep.subr.bf16.mxu0 %v237_v0  ;;  %227 = vmatprep.subr.bf16.mxu1 %v237_v0  ;;  %v240_v4 = vld [vmem:[%s324_s1 + $0x24] ss:$8 sps:$4 sm:$0xff]   ;;  %v242_v5 = vld [vmem:[%s324_s1 + $0x20] ss:$8 sps:$4 sm:$0xff]  }
   0x3   :  { %103 = vmatpush1.bf16.msra.mxu0 %v239_v3  ;;  %231 = vmatpush1.bf16.msra.mxu1 %v239_v3  ;;  %v243_v6 = vld [vmem:[%s324_s1 + $0x14] ss:$8 sps:$4 sm:$0xff]   ;;  %v245_v7 = vld [vmem:[%s324_s1 + $0x10] ss:$8 sps:$4 sm:$0xff]   ;;  %v246_v8 = vld [vmem:[%s324_s1 + $0x4] ss:$8 sps:$4 sm:$0xff]  }
   0x4   :  { %104 = vmatprep.subr.bf16.mxu0 %v240_v4  ;;  %228 = vmatprep.subr.bf16.mxu1 %v240_v4  ;;  %v248_v9 = vld [vmem:[%s324_s1] ss:$8 sps:$4 sm:$0xff]   ;;  %v35_v12 = vld [vmem:[%s325_s0 + $0x10] sm:$0xff]  ;;  %v36_v13 = vld [vmem:[%s325_s0 + $0x18] sm:$0xff]  ;;  %vm199_vm2 = vcmask 523268  }
   0x5   :  { %v33_v10 = vld [vmem:[%s325_s0] sm:$0xff]  ;;  %v34_v11 = vld [vmem:[%s325_s0 + $0x8] sm:$0xff]  ;;  %v38_v15 = vpack.c.bf16 %v36_v13, %v35_v12  ;;  %vm200_vm3 = vmor %vm199_vm2, %vm198_vm1 }
   0x6   :  { %v37_v14 = vpack.c.bf16 %v34_v11, %v33_v10 }
   0x7   :  { %105 = vmatpush1.bf16.msra.mxu0 %v242_v5  ;;  %232 = vmatpush1.bf16.msra.mxu1 %v242_v5 }
   0x8   :  { %106 = vmatprep.subr.bf16.mxu0 %v243_v6  ;;  %229 = vmatprep.subr.bf16.mxu1 %v243_v6  ;;  %v26_v18 = vld [vmem:[#allocation2 + $0x8] sm:$0xff]  ;;  %v28_v26 = vld [vmem:[#allocation2 + $0x18] sm:$0xff] }
   0x9   :  { %v30_v19 = vld [vmem:[#allocation2 + $0x28] sm:$0xff]  ;;  %v32_v27 = vld [vmem:[#allocation2 + $0x38] sm:$0xff] }
   0xb   :  { %107 = vmatpush1.bf16.msra.mxu0 %v245_v7  ;;  %233 = vmatpush1.bf16.msra.mxu1 %v245_v7 }
   0xc   :  { %108 = vmatprep.subr.bf16.mxu0 %v246_v8  ;;  %230 = vmatprep.subr.bf16.mxu1 %v246_v8 }
   0xf   :  { %109 = vmatpush1.bf16.msra.mxu0 %v248_v9  ;;  %234 = vmatpush1.bf16.msra.mxu1 %v248_v9 }
  0x12   :  { %217 = vmatmul.mubr.msk.bf16.vlgmr.msra.gmra.mxu0 %vm17_vm0, %v37_v14  ;;  %218 = vmatmul.mubr.msk.bf16.vlgmr.msra.gmra.mxu1 %vm17_vm0, %v38_v15 }
  0xd2   :  { %v128_v16 = vpop.f32.mrf.mxu0  ;;  %v138_v17 = vpop.f32.mrf.mxu1 }
  0xd4   :  { %v130_v20 = vpop.f32.mrf.mxu0  ;;  %v140_v21 = vpop.f32.mrf.mxu1 }
  0xd5   :  { %v148_v22 = vadd.f32 %v130_v20, %v26_v18  ;;  %v152_v23 = vadd.f32 %v140_v21, %v30_v19 }
  0xd6   :  { %v132_v24 = vpop.f32.mrf.mxu0  ;;  %v142_v25 = vpop.f32.mrf.mxu1 }
  0xd7   :  { %156 = vst.msk [vmem:[#allocation2 + $0x8] sm:$0xff] %vm17_vm0, %v148_v22  ;;  %160 = vst.msk [vmem:[#allocation2 + $0x28] sm:$0xff] %vm17_vm0, %v152_v23 }
  0xd8   :  { %v134_v28 = vpop.f32.mrf.mxu0  ;;  %v144_v29 = vpop.f32.mrf.mxu1 }
  0xd9   :  { %v150_v30 = vadd.f32 %v134_v28, %v28_v26  ;;  %v154_v31 = vadd.f32 %v144_v29, %v32_v27 }
  0xdb   :  { %158 = vst.msk [vmem:[#allocation2 + $0x18] sm:$0xff] %vm17_vm0, %v150_v30  ;;  %162 = vst.msk [vmem:[#allocation2 + $0x38] sm:$0xff] %vm17_vm0, %v154_v31 }
  0xde   :  { %v167_v32 = vld [vmem:[#allocation2 + $0x8] sm:$0xff] }
  0xdf   :  { %v171_v33 = vld [vmem:[#allocation2 + $0x28] sm:$0xff]  ;;  %v223_v34 = vpack.c.bf16 %v167_v32, %v128_v16 }
  0xe0   :  { %v225_v35 = vpack.c.bf16 %v171_v33, %v138_v17 }
  0xe1   :  { %201 = vst.msk [vmem:[%s326_s2] sm:$0xff] %vm200_vm3, %v223_v34 }
  0xe2   :  { %203 = vst.msk [vmem:[%s326_s2 + $0x10] sm:$0xff] %vm200_vm3, %v225_v35  ;;  %v169_v36 = vld [vmem:[#allocation2 + $0x18] sm:$0xff] }
  0xe3   :  { %v173_v37 = vld [vmem:[#allocation2 + $0x38] sm:$0xff]  ;;  %v224_v38 = vpack.c.bf16 %v169_v36, %v132_v24 }
  0xe4   :  { %v226_v39 = vpack.c.bf16 %v173_v37, %v142_v25 }
  0xe5   :  { %202 = vst.msk [vmem:[%s326_s2 + $0x8] sm:$0xff] %vm200_vm3, %v224_v38 }
  0xe6   :  { %204 = vst.msk [vmem:[%s326_s2 + $0x18] sm:$0xff] %vm200_vm3, %v226_v39 }

// kernel: multihead_diff_attention.5
= control target key start
LH: loop header
LB: loop body
LE: loop exit
PB: predicated region body
PF: predicated region fallthrough
CT: control target
= control target key end

     0   :  { %vm17_vm0 = vcmask 523264   ;;  %v210_v2 = vmov 0.0   ;;  %s260_s0 = inlined_call_operand.vmem [shape: bf16[32,64], index: 0, kind: input, shape index: {}]   ;;  %s261_s1 = inlined_call_operand.vmem [shape: bf16[64,64], index: 1, kind: input, shape index: {}]   ;;  %s262_s2 = inlined_call_operand.hbm [shape: f32[32,64], index: 2, kind: output, shape index: {}]  }
   0x1   :  { %v182_v0 = vld [vmem:[%s261_s1 + $0x18] sm:$0xff]   ;;  %v183_v1 = vld [vmem:[%s261_s1 + $0x10] sm:$0xff]   ;;  %20 = vst.msk [vmem:[#allocation2 + $0x10] sm:$0xff] %vm17_vm0, %v210_v2  ;;  %18 = vst.msk [vmem:[#allocation2] sm:$0xff] %vm17_vm0, %v210_v2 }
   0x2   :  { %166 = vmatprep.subr.bf16.mxu0 %v182_v0  ;;  %19 = vst.msk [vmem:[#allocation2 + $0x8] sm:$0xff] %vm17_vm0, %v210_v2  ;;  %21 = vst.msk [vmem:[#allocation2 + $0x18] sm:$0xff] %vm17_vm0, %v210_v2  ;;  %v184_v3 = vld [vmem:[%s261_s1 + $0x8] sm:$0xff]   ;;  %v186_v4 = vld [vmem:[%s260_s0] sm:$0xff]  }
   0x3   :  { %167 = vmatpush3.bf16.msra.mxu0 %v182_v0  ;;  %174 = vmatprep.mubr.msk.bf16.mxu0 %vm17_vm0, %v186_v4 }
   0x4   :  { %168 = vmatprep.subr.bf16.mxu0 %v183_v1 }
   0x5   :  { %7 = vsyncpa [#allocation3], 0  ;;  %v185_v5 = vld [vmem:[%s261_s1] sm:$0xff]   ;;  %v187_v6 = vld [vmem:[%s260_s0 + $0x8] sm:$0xff]   ;;  %s211_s21 = smov [#allocation2]  }
   0x6   :  { %s141_s1 = sshll.u32 %s211_s21, 4  ;;  %s142_s1 = int_to_ptr.vmem [resolvable:$true] %s141_s1 }
   0x7   :  { %169 = vmatpush3.bf16.msra.mxu0 %v183_v1  ;;  %s188_s0 = scalar_lea.vmem %s142_s1, 512  ;;  %p193_p1 = scmp.lt.s32.totalorder %s142_s1, %s142_s1 }
   0x8   :  { %170 = vmatprep.subr.bf16.mxu0 %v184_v3  ;;  %v24_v7 = vld [vmem:[#allocation2 + $0x10] sm:$0xff]  ;;  %v22_v9 = vld [vmem:[#allocation2] sm:$0xff]  ;;  %p189_p0 = scmp.ne.s32.totalorder %s142_s1, %s188_s0  ;;  %p194_p2 = scmp.lt.s32.totalorder %s188_s0, %s188_s0 }
   0x9   :  { %v25_v12 = vld [vmem:[#allocation2 + $0x18] sm:$0xff]  ;;  %v23_v15 = vld [vmem:[#allocation2 + $0x8] sm:$0xff] }
   0xa   :  { %p195_p3 = por %p194_p2, %p193_p1 }
   0xb   :  { %171 = vmatpush3.bf16.msra.mxu0 %v184_v3 }
   0xc   :  { %172 = vmatprep.subr.bf16.mxu0 %v185_v5  ;;  %p196_p4 = pnand %p195_p3, %p189_p0 }
   0xf   :  { %173 = vmatpush3.bf16.msra.mxu0 %v185_v5 }
  0x12   :  { %175 = vmatmul.mubr.msk.bf16.vlgmr.msra.gmra.mxu0 %vm17_vm0, %v187_v6 }
  0xd2   :  { %v176_v8 = vpop.f32.mrf.mxu0 }
  0xd3   :  { %v130_v10 = vadd.f32 %v176_v8, %v24_v7 }
  0xd4   :  { %v113_v11 = vpop.f32.mrf.mxu0 }
  0xd5   :  { %134 = vst.msk [vmem:[#allocation2 + $0x10] sm:$0xff] %vm17_vm0, %v130_v10  ;;  %v128_v13 = vadd.f32 %v113_v11, %v22_v9 }
  0xd6   :  { %v177_v14 = vpop.f32.mrf.mxu0 }
  0xd7   :  { %132 = vst.msk [vmem:[#allocation2] sm:$0xff] %vm17_vm0, %v128_v13  ;;  %v131_v16 = vadd.f32 %v177_v14, %v25_v12 }
  0xd8   :  { %v116_v17 = vpop.f32.mrf.mxu0 }
  0xd9   :  { %135 = vst.msk [vmem:[#allocation2 + $0x18] sm:$0xff] %vm17_vm0, %v131_v16  ;;  %v129_v18 = vadd.f32 %v116_v17, %v23_v15 }
  0xdb   :  { %133 = vst.msk [vmem:[#allocation2 + $0x8] sm:$0xff] %vm17_vm0, %v129_v18 }
  0xdc   :  { %199 = shalt.err (!%p196_p4)
}
  0xdd   :  { %s212_s22 = smov 128   ;;  %s213_s23 = smov 8  }
  0xde   :  { %147 = dma.vmem_to_hbm [thread:$0]  %s142_s1, 512, %s262_s2, [#allocation3], %s212_s22, %s212_s22, %s213_s23  }
  0xdf   :  { %208 = dma.done.wait [#allocation3], 512  }
  0xe0   :  { %209 = vsyncadd [#allocation3], 4294966784 }
  0xe1   :  { %151 = vsyncpa [#allocation3], 1 }

// kernel: multihead_diff_attention.4
= control target key start
LH: loop header
LB: loop body
LE: loop exit
PB: predicated region body
PF: predicated region fallthrough
CT: control target
= control target key end

     0   :  { %s2571_s20 = smov 0   ;;  %s2573_s21 = smov 0   ;;  %s3227_s0 = inlined_call_operand.<no memory space> [shape: f32[1,1], index: 0, kind: input, shape index: {}]   ;;  %s3228_s1 = inlined_call_operand.vmem [shape: bf16[2,4,2,16,8], index: 1, kind: input, shape index: {}]   ;;  %s3229_s2 = inlined_call_operand.vmem [shape: bf16[2,4,2,16,8], index: 2, kind: input, shape index: {}]   ;;  %s3230_s3 = inlined_call_operand.vmem [shape: bf16[2,4,16,16], index: 3, kind: input, shape index: {}]   ;;  %s3231_s4 = inlined_call_operand.vmem [shape: f32[1,16], index: 4, kind: input, shape index: {}]   ;;  %s3232_s5 = inlined_call_operand.vmem [shape: bf16[2,16,64], index: 5, kind: output, shape index: {}]  }
   0x1   :  { %10 = sst [smem:[#allocation5]] %s3227_s0  ;;  %s2575_s22 = smov 0  }
   0x2 LB: > { %s42_s0 = sadd.s32 1, %s2525_s21  ;;  %p2188_p0 = scmp.ge.s32.totalorder %s2529_s22, 1  ;;  %s2529_s22 = sphi %s2575_s22, %s16_s22   ;;  %s2525_s21 = sphi %s2573_s21, %s3249_s21   ;;  %s2521_s20 = sphi %s2571_s20, %s3248_s20  }
   0x3   : > { %p44_p1 = scmp.ge.s32.totalorder %s42_s0, 2  ;;  %p283_p2 = scmp.lt.s32.totalorder %s2529_s22, 3 }
   0x5   : > { %s3251_s0 = smov (%p44_p1, %s42_s0), 0  ;;  %p284_p3 = pnand %p2188_p0, %p283_p2 }
   0x6   : > { %p357_p4 = scmp.lt.s32.totalorder (!%p284_p3), %s2521_s20, 1  ;;  %s1753_s9 = sld [smem:[#allocation5]] (!%p284_p3) }
   0x7   : > { %287 = sbr.rel (%p284_p3) target bundleno = 1121 (0x461), region = 40  ;;  %s2535_s12 = smov (!%p284_p3), 16  }
   0x8   : > { %s2536_s13 = smov (!%p284_p3), 32   ;;  %s2537_s14 = smov (!%p284_p3), 48  }
   0xc   : > { %v2531_v0 = vmov 0.0   ;;  %s3253_s20 = smov (!%p357_p4, %s2521_s20), 1  ;;  %vm2532_vm0 = vmmov 0   ;;  %vm521_vm1 = vcmask 64512   ;;  %vm454_vm2 = vcmask 130048  }
   0xd   : > { %2270 = vmatprep.subr.bf16.mxu0 %v2531_v0  ;;  %2276 = vmatprep.subr.bf16.mxu1 %v2531_v0  ;;  %s2238_s23 = sshll.u32 %s3253_s20, 6  ;;  %455 = vst.msk [vmem:[#allocation4] sm:$0xff] %vm454_vm2, %v2531_v0  ;;  %456 = vst.msk [vmem:[#allocation4 + $0x8] sm:$0xff] %vm454_vm2, %v2531_v0  ;;  %vm421_vm3 = vcmask 7168   ;;  %v2533_v25 = vmov -inf   ;;  %v2534_v50 = vmov 0  }
   0xe   : > { %2272 = vmatprep.mubr.msk.bf16.mxu0 %vm2532_vm0, %v2531_v0  ;;  %2278 = vmatprep.mubr.msk.bf16.mxu1 %vm2532_vm0, %v2531_v0  ;;  %s2601_s26 = scalar_lea.vmem %s3229_s2, %s2238_s23  ;;  %s2607_s29 = scalar_lea.vmem %s3228_s1, %s2238_s23  ;;  %457 = vst.msk [vmem:[#allocation4 + $0x10] sm:$0xff] %vm454_vm2, %v2531_v0  ;;  %458 = vst.msk [vmem:[#allocation4 + $0x18] sm:$0xff] %vm454_vm2, %v2531_v0  ;;  %vm2011_vm4 = vcmask 261120   ;;  %vm2014_vm5 = vcmask 392192   ;;  %vm2024_vm6 = vcmask 519168  }
   0xf   : > { %v2375_v1 = vld [vmem:[%s2601_s26] sm:$0xff]   ;;  %v2376_v2 = vld [vmem:[%s2601_s26 + $0x8] sm:$0xff]   ;;  %v2379_v5 = vld [vmem:[%s2601_s26 + $0x10] sm:$0xff]   ;;  %459 = vst.msk [vmem:[#allocation4 + $0x20] sm:$0xff] %vm454_vm2, %v2531_v0  ;;  %2374 = vset.pattern.permute.xlu1 %v2534_v50  ;;  %2373 = vset.pattern.permute.xlu0 %v2534_v50  ;;  %s2240_s30 = sshll.u32 %s3253_s20, 5  ;;  %s2241_s15 = sshll.u32 %s3253_s20, 3 }
  0x10   : > { %v526_v3 = vsel %vm521_vm1, %v2375_v1, 0  ;;  %v583_v4 = vsel %vm521_vm1, %v2376_v2, 0  ;;  %v2380_v6 = vld [vmem:[%s2601_s26 + $0x18] sm:$0xff]   ;;  %v2377_v7 = vld [vmem:[%s2607_s29] sm:$0xff]   ;;  %v2378_v8 = vld [vmem:[%s2607_s29 + $0x8] sm:$0xff]   ;;  %v640_v9 = vsel %vm521_vm1, %v2379_v5, 0  ;;  %s2907_s8 = scalar_lea.vmem %s3230_s3, %s2240_s30  ;;  %s414_s18 = scalar_lea.vmem %s3232_s5, %s2241_s15 }
  0x11   : > { %2271 = vmatpush3.bf16.xpose.msra.mxu0 %v526_v3  ;;  %2277 = vmatpush3.bf16.xpose.msra.mxu1 %v583_v4  ;;  %v697_v10 = vsel %vm521_vm1, %v2380_v6, 0  ;;  %v2382_v11 = vld [vmem:[%s2601_s26 + $0x20] sm:$0xff]   ;;  %v2384_v12 = vld [vmem:[%s2601_s26 + $0x28] sm:$0xff]   ;;  %v2381_v13 = vld [vmem:[%s2607_s29 + $0x10] sm:$0xff]   ;;  %460 = vst.msk [vmem:[#allocation4 + $0x28] sm:$0xff] %vm454_vm2, %v2531_v0 }
  0x12   : > { %2282 = vmatprep.subr.bf16.mxu0 %v2531_v0  ;;  %2288 = vmatprep.subr.bf16.mxu1 %v2531_v0  ;;  %v2383_v14 = vld [vmem:[%s2607_s29 + $0x18] sm:$0xff]   ;;  %v754_v15 = vsel %vm521_vm1, %v2382_v11, 0  ;;  %v811_v16 = vsel %vm521_vm1, %v2384_v12, 0  ;;  %v2386_v17 = vld [vmem:[%s2601_s26 + $0x30] sm:$0xff]   ;;  %v2385_v19 = vld [vmem:[%s2607_s29 + $0x20] sm:$0xff]   ;;  %461 = vst.msk [vmem:[#allocation4 + $0x30] sm:$0xff] %vm454_vm2, %v2531_v0 }
  0x13   : > { %v2388_v18 = vld [vmem:[%s2601_s26 + $0x38] sm:$0xff]   ;;  %v2387_v20 = vld [vmem:[%s2607_s29 + $0x28] sm:$0xff]   ;;  %v868_v21 = vsel %vm521_vm1, %v2386_v17, 0  ;;  %v2389_v23 = vld [vmem:[%s2607_s29 + $0x30] sm:$0xff]   ;;  %462 = vst.msk [vmem:[#allocation4 + $0x38] sm:$0xff] %vm454_vm2, %v2531_v0 }
  0x14   : > { %v925_v22 = vsel %vm521_vm1, %v2388_v18, 0  ;;  %v2390_v24 = vld [vmem:[%s2607_s29 + $0x38] sm:$0xff]   ;;  %463 = vst.msk [vmem:[#allocation4 + $0x40] sm:$0xff] %vm454_vm2, %v2531_v0  ;;  %464 = vst.msk [vmem:[#allocation4 + $0x48] sm:$0xff] %vm454_vm2, %v2531_v0 }
  0x15   : > { %465 = vst.msk [vmem:[#allocation4 + $0x50] sm:$0xff] %vm454_vm2, %v2531_v0  ;;  %466 = vst.msk [vmem:[#allocation4 + $0x58] sm:$0xff] %vm454_vm2, %v2531_v0 }
  0x16   : > { %467 = vst.msk [vmem:[#allocation4 + $0x60] sm:$0xff] %vm454_vm2, %v2531_v0  ;;  %468 = vst.msk [vmem:[#allocation4 + $0x68] sm:$0xff] %vm454_vm2, %v2531_v0 }
  0x17   : > { %469 = vst.msk [vmem:[#allocation4 + $0x70] sm:$0xff] %vm454_vm2, %v2531_v0  ;;  %470 = vst.msk [vmem:[#allocation4 + $0x78] sm:$0xff] %vm454_vm2, %v2531_v0 }
  0x18   : > { %2273 = vmatmul.mubr.msk.bf16.vlgmr.msra.gmra.mxu0 %vm521_vm1, %v2377_v7  ;;  %2279 = vmatmul.mubr.msk.bf16.vlgmr.msra.gmra.mxu1 %vm521_vm1, %v2378_v8  ;;  %424 = vst.msk [vmem:[#allocation2 + $0x10] sm:$0xff] %vm421_vm3, %v2533_v25  ;;  %422 = vst.msk [vmem:[#allocation2] sm:$0xff] %vm421_vm3, %v2533_v25 }
  0x19   : > { %2283 = vmatpush3.bf16.xpose.msra.mxu0 %v640_v9  ;;  %2289 = vmatpush3.bf16.xpose.msra.mxu1 %v697_v10  ;;  %423 = vst.msk [vmem:[#allocation2 + $0x8] sm:$0xff] %vm421_vm3, %v2533_v25  ;;  %425 = vst.msk [vmem:[#allocation2 + $0x18] sm:$0xff] %vm421_vm3, %v2533_v25 }
  0x1a   : > { %2284 = vmatprep.mubr.msk.bf16.mxu0 %vm2532_vm0, %v2531_v0  ;;  %2294 = vmatprep.subr.bf16.mxu0 %v2531_v0  ;;  %426 = vst.msk [vmem:[#allocation2 + $0x20] sm:$0xff] %vm421_vm3, %v2533_v25  ;;  %427 = vst.msk [vmem:[#allocation2 + $0x28] sm:$0xff] %vm421_vm3, %v2533_v25 }
  0x1b   : > { %2290 = vmatprep.mubr.msk.bf16.mxu1 %vm2532_vm0, %v2531_v0  ;;  %2300 = vmatprep.subr.bf16.mxu1 %v2531_v0  ;;  %428 = vst.msk [vmem:[#allocation2 + $0x30] sm:$0xff] %vm421_vm3, %v2533_v25  ;;  %429 = vst.msk [vmem:[#allocation2 + $0x38] sm:$0xff] %vm421_vm3, %v2533_v25 }
  0x1c   : > { %430 = vst.msk [vmem:[#allocation2 + $0x40] sm:$0xff] %vm421_vm3, %v2533_v25  ;;  %431 = vst.msk [vmem:[#allocation2 + $0x48] sm:$0xff] %vm421_vm3, %v2533_v25 }
  0x1d   : > { %432 = vst.msk [vmem:[#allocation2 + $0x50] sm:$0xff] %vm421_vm3, %v2533_v25  ;;  %433 = vst.msk [vmem:[#allocation2 + $0x58] sm:$0xff] %vm421_vm3, %v2533_v25 }
  0x1e   : > { %434 = vst.msk [vmem:[#allocation2 + $0x60] sm:$0xff] %vm421_vm3, %v2533_v25  ;;  %435 = vst.msk [vmem:[#allocation2 + $0x68] sm:$0xff] %vm421_vm3, %v2533_v25 }
  0x1f   : > { %436 = vst.msk [vmem:[#allocation2 + $0x70] sm:$0xff] %vm421_vm3, %v2533_v25  ;;  %437 = vst.msk [vmem:[#allocation2 + $0x78] sm:$0xff] %vm421_vm3, %v2533_v25  ;;  %v2802_v11 = vld [vmem:[#allocation2] sm:$0xff]  ;;  %v2804_v12 = vld [vmem:[#allocation2 + $0x10] sm:$0xff] }
  0x20   : > { %2285 = vmatmul.mubr.msk.bf16.vlgmr.msra.gmra.mxu0 %vm521_vm1, %v2381_v13  ;;  %2291 = vmatmul.mubr.msk.bf16.vlgmr.msra.gmra.mxu1 %vm521_vm1, %v2383_v14  ;;  %438 = vst.msk [vmem:[#allocation3] sm:$0xff] %vm421_vm3, %v2531_v0  ;;  %439 = vst.msk [vmem:[#allocation3 + $0x8] sm:$0xff] %vm421_vm3, %v2531_v0  ;;  %v2812_v17 = vld [vmem:[#allocation2 + $0x8] sm:$0xff] }
  0x21   : > { %2295 = vmatpush3.bf16.xpose.msra.mxu0 %v754_v15  ;;  %2301 = vmatpush3.bf16.xpose.msra.mxu1 %v811_v16  ;;  %440 = vst.msk [vmem:[#allocation3 + $0x10] sm:$0xff] %vm421_vm3, %v2531_v0  ;;  %441 = vst.msk [vmem:[#allocation3 + $0x18] sm:$0xff] %vm421_vm3, %v2531_v0  ;;  %v2832_v25 = vld [vmem:[#allocation2 + $0x20] sm:$0xff] }
  0x22   : > { %2296 = vmatprep.mubr.msk.bf16.mxu0 %vm2532_vm0, %v2531_v0  ;;  %2306 = vmatprep.subr.bf16.mxu0 %v2531_v0  ;;  %442 = vst.msk [vmem:[#allocation3 + $0x20] sm:$0xff] %vm421_vm3, %v2531_v0  ;;  %443 = vst.msk [vmem:[#allocation3 + $0x28] sm:$0xff] %vm421_vm3, %v2531_v0 }
  0x23   : > { %2302 = vmatprep.mubr.msk.bf16.mxu1 %vm2532_vm0, %v2531_v0  ;;  %2312 = vmatprep.subr.bf16.mxu1 %v2531_v0  ;;  %444 = vst.msk [vmem:[#allocation3 + $0x30] sm:$0xff] %vm421_vm3, %v2531_v0  ;;  %445 = vst.msk [vmem:[#allocation3 + $0x38] sm:$0xff] %vm421_vm3, %v2531_v0 }
  0x24   : > { %446 = vst.msk [vmem:[#allocation3 + $0x40] sm:$0xff] %vm421_vm3, %v2531_v0  ;;  %447 = vst.msk [vmem:[#allocation3 + $0x48] sm:$0xff] %vm421_vm3, %v2531_v0 }
  0x25   : > { %448 = vst.msk [vmem:[#allocation3 + $0x50] sm:$0xff] %vm421_vm3, %v2531_v0  ;;  %449 = vst.msk [vmem:[#allocation3 + $0x58] sm:$0xff] %vm421_vm3, %v2531_v0 }
  0x26   : > { %450 = vst.msk [vmem:[#allocation3 + $0x60] sm:$0xff] %vm421_vm3, %v2531_v0  ;;  %451 = vst.msk [vmem:[#allocation3 + $0x68] sm:$0xff] %vm421_vm3, %v2531_v0 }
  0x27   : > { %452 = vst.msk [vmem:[#allocation3 + $0x70] sm:$0xff] %vm421_vm3, %v2531_v0  ;;  %453 = vst.msk [vmem:[#allocation3 + $0x78] sm:$0xff] %vm421_vm3, %v2531_v0 }
  0x28   : > { %2297 = vmatmul.mubr.msk.bf16.vlgmr.msra.gmra.mxu0 %vm521_vm1, %v2385_v19  ;;  %2303 = vmatmul.mubr.msk.bf16.vlgmr.msra.gmra.mxu1 %vm521_vm1, %v2387_v20  ;;  %v2819_v19 = vld [vmem:[#allocation2 + $0x18] sm:$0xff]  ;;  %v2392_v20 = vld [vmem:[%s2907_s8 + $0x8] sm:$0xff]  }
  0x29   : > { %2307 = vmatpush3.bf16.xpose.msra.mxu0 %v868_v21  ;;  %2313 = vmatpush3.bf16.xpose.msra.mxu1 %v925_v22 }
  0x2a   : > { %2308 = vmatprep.mubr.msk.bf16.mxu0 %vm2532_vm0, %v2531_v0  ;;  %2314 = vmatprep.mubr.msk.bf16.mxu1 %vm2532_vm0, %v2531_v0 }
  0x2b   : > { %2324 = vmatprep.subr.bf16.mxu1 %v2392_v20 }
  0x30   : > { %2309 = vmatmul.mubr.msk.bf16.vlgmr.msra.gmra.mxu0 %vm521_vm1, %v2389_v23  ;;  %2315 = vmatmul.mubr.msk.bf16.vlgmr.msra.gmra.mxu1 %vm521_vm1, %v2390_v24 }
  0x31   : > { %2325 = vmatpush3.bf16.msra.mxu1 %v2392_v20 }
  0xd8   : > { %v2738_v26 = vpop.f32.mrf.mxu0  ;;  %v2740_v27 = vpop.f32.mrf.mxu1 }
  0xd9   : > { %v985_v28 = vsel %vm454_vm2, %v2738_v26, -inf  ;;  %v991_v29 = vsel %vm454_vm2, %v2740_v27, -inf }
  0xda   : > { %986 = vmax.xlane.f32.xlu0 %v985_v28  ;;  %v2274_v30 = vpop.f32.mrf.mxu0  ;;  %992 = vmax.xlane.f32.xlu1 %v991_v29  ;;  %v2280_v31 = vpop.f32.mrf.mxu1  ;;  %v2393_v28 = vld [vmem:[%s2907_s8 + $0x10] sm:$0xff]  }
  0xdc   : > { %v2746_v32 = vpop.f32.mrf.mxu0  ;;  %v2748_v33 = vpop.f32.mrf.mxu1 }
  0xdd   : > { %v988_v34 = vsel %vm454_vm2, %v2746_v32, -inf  ;;  %v994_v35 = vsel %vm454_vm2, %v2748_v33, -inf }
  0xde   : > { %989 = vmax.xlane.f32.xlu0 %v988_v34  ;;  %v2275_v36 = vpop.f32.mrf.mxu0  ;;  %995 = vmax.xlane.f32.xlu1 %v994_v35  ;;  %v2281_v37 = vpop.f32.mrf.mxu1  ;;  %v2846_v34 = vld [vmem:[#allocation2 + $0x28] sm:$0xff]  ;;  %v2848_v35 = vld [vmem:[#allocation2 + $0x30] sm:$0xff] }
  0xe0   : > { %v2754_v38 = vpop.f32.mrf.mxu0  ;;  %v2756_v39 = vpop.f32.mrf.mxu1 }
  0xe1   : > { %v997_v40 = vsel %vm454_vm2, %v2754_v38, -inf  ;;  %v1003_v43 = vsel %vm454_vm2, %v2756_v39, -inf }
  0xe2   : > { %v2286_v41 = vpop.f32.mrf.mxu0  ;;  %998 = vmax.xlane.f32.xlu0 %v997_v40  ;;  %v2292_v42 = vpop.f32.mrf.mxu1 }
  0xe4   : > { %v2762_v44 = vpop.f32.mrf.mxu0  ;;  %v2764_v45 = vpop.f32.mrf.mxu1 }
  0xe5   : > { %v1000_v46 = vsel %vm454_vm2, %v2762_v44, -inf  ;;  %v1006_v49 = vsel %vm454_vm2, %v2764_v45, -inf }
  0xe6   : > { %1001 = vmax.xlane.f32.xlu1 %v1000_v46  ;;  %v2287_v47 = vpop.f32.mrf.mxu0  ;;  %1004 = vmax.xlane.f32.xlu0 %v1003_v43  ;;  %v2293_v48 = vpop.f32.mrf.mxu1  ;;  %v2861_v43 = vld [vmem:[#allocation2 + $0x38] sm:$0xff]  ;;  %v2863_v46 = vld [vmem:[#allocation2 + $0x40] sm:$0xff] }
  0xe8   : > { %v2770_v51 = vpop.f32.mrf.mxu0  ;;  %v2772_v52 = vpop.f32.mrf.mxu1 }
  0xe9   : > { %v1009_v53 = vsel %vm454_vm2, %v2770_v51, -inf  ;;  %v1015_v56 = vsel %vm454_vm2, %v2772_v52, -inf }
  0xea   : > { %1007 = vmax.xlane.f32.xlu1 %v1006_v49  ;;  %v2298_v54 = vpop.f32.mrf.mxu0  ;;  %1010 = vmax.xlane.f32.xlu0 %v1009_v53  ;;  %v2304_v55 = vpop.f32.mrf.mxu1 }
  0xeb   : > { %v2880_v55 = vld [vmem:[#allocation2 + $0x48] sm:$0xff] }
  0xec   : > { %v2778_v57 = vpop.f32.mrf.mxu0  ;;  %v2782_v59 = vpop.f32.mrf.mxu1 }
  0xed   : > { %v1012_v58 = vsel %vm454_vm2, %v2778_v57, -inf  ;;  %v1018_v62 = vsel %vm454_vm2, %v2782_v59, -inf }
  0xee   : > { %1013 = vmax.xlane.f32.xlu1 %v1012_v58  ;;  %v2299_v60 = vpop.f32.mrf.mxu0  ;;  %1016 = vmax.xlane.f32.xlu0 %v1015_v56  ;;  %v2305_v61 = vpop.f32.mrf.mxu1  ;;  %v2882_v56 = vld [vmem:[#allocation2 + $0x50] sm:$0xff] }
  0xf0   : > { %v2786_v63 = vpop.f32.mrf.mxu0  ;;  %v2788_v0 = vpop.f32.mrf.mxu1 }
  0xf1   : > { %v1021_v1 = vsel %vm454_vm2, %v2786_v63, -inf  ;;  %v1027_v4 = vsel %vm454_vm2, %v2788_v0, -inf }
  0xf2   : > { %1019 = vmax.xlane.f32.xlu1 %v1018_v62  ;;  %v2310_v2 = vpop.f32.mrf.mxu0  ;;  %1022 = vmax.xlane.f32.xlu0 %v1021_v1  ;;  %v2316_v3 = vpop.f32.mrf.mxu1 }
  0xf3   : > { %v2897_v2 = vld [vmem:[#allocation2 + $0x58] sm:$0xff] }
  0xf4   : > { %v2794_v5 = vpop.f32.mrf.mxu0  ;;  %v2798_v7 = vpop.f32.mrf.mxu1 }
  0xf5   : > { %v1024_v6 = vsel %vm454_vm2, %v2794_v5, -inf  ;;  %v1030_v9 = vsel %vm454_vm2, %v2798_v7, -inf }
  0xf6   : > { %1025 = vmax.xlane.f32.xlu1 %v1024_v6  ;;  %v2311_v8 = vpop.f32.mrf.mxu0  ;;  %1028 = vmax.xlane.f32.xlu0 %v1027_v4  ;;  %v2317_v10 = vpop.f32.mrf.mxu1  ;;  %v2902_v4 = vld [vmem:[#allocation2 + $0x60] sm:$0xff] }
  0xf7   : > { %v2391_v6 = vld [vmem:[%s2907_s8] sm:$0xff]  }
  0xf8   : > { %2318 = vmatprep.subr.bf16.mxu0 %v2391_v6 }
  0xf9   : > { %2319 = vmatpush3.bf16.msra.mxu0 %v2391_v6  ;;  %v2946_v6 = vld [vmem:[#allocation2 + $0x78] sm:$0xff] }
  0xfa   : > { %1031 = vmax.xlane.f32.xlu1 %v1030_v9  ;;  %2330 = vmatprep.subr.bf16.mxu0 %v2393_v28 }
 0x163   : > { %v987_v13 = vpop.xlane.xlu0 %986  ;;  %v993_v14 = vpop.xlane.xlu1 %992 }
 0x164   : > { %v2807_v15 = vmax.f32 %v2802_v11, %v987_v13  ;;  %v2810_v16 = vmax.f32 %v2804_v12, %v993_v14 }
 0x166   : > { %1734 = vst.msk [vmem:[#allocation2] sm:$0xff] %vm421_vm3, %v2807_v15  ;;  %1099 = vperm.xlu0 %2373, %v2807_v15   ;;  %1736 = vst.msk [vmem:[#allocation2 + $0x10] sm:$0xff] %vm421_vm3, %v2810_v16  ;;  %1109 = vperm.xlu1 %2374, %v2810_v16  }
 0x167   : > { %v990_v21 = vpop.xlane.xlu0 %989  ;;  %v996_v22 = vpop.xlane.xlu1 %995 }
 0x168   : > { %v2827_v23 = vmax.f32 %v2812_v17, %v990_v21  ;;  %v2830_v24 = vmax.f32 %v2819_v19, %v996_v22  ;;  %v2926_v22 = vld [vmem:[#allocation2 + $0x68] sm:$0xff] }
 0x16a   : > { %1735 = vst.msk [vmem:[#allocation2 + $0x8] sm:$0xff] %vm421_vm3, %v2827_v23  ;;  %1737 = vst.msk [vmem:[#allocation2 + $0x18] sm:$0xff] %vm421_vm3, %v2830_v24  ;;  %1104 = vperm.xlu1 %2374, %v2827_v23  }
 0x16b   : > { %v999_v30 = vpop.xlane.xlu0 %998 }
 0x16c   : > { %v2844_v31 = vmax.f32 %v2832_v25, %v999_v30  ;;  %v2928_v30 = vld [vmem:[#allocation2 + $0x70] sm:$0xff] }
 0x16e   : > { %1738 = vst.msk [vmem:[#allocation2 + $0x20] sm:$0xff] %vm421_vm3, %v2844_v31  ;;  %1114 = vperm.xlu1 %2374, %v2830_v24  }
 0x16f   : > { %v1002_v37 = vpop.xlane.xlu1 %1001  ;;  %v1005_v40 = vpop.xlane.xlu0 %1004 }
 0x170   : > { %v2856_v41 = vmax.f32 %v2846_v34, %v1002_v37  ;;  %v2859_v42 = vmax.f32 %v2848_v35, %v1005_v40 }
 0x172   : > { %1739 = vst.msk [vmem:[#allocation2 + $0x28] sm:$0xff] %vm421_vm3, %v2856_v41  ;;  %1740 = vst.msk [vmem:[#allocation2 + $0x30] sm:$0xff] %vm421_vm3, %v2859_v42  ;;  %1119 = vperm.xlu1 %2374, %v2844_v31  }
 0x173   : > { %v1008_v49 = vpop.xlane.xlu1 %1007  ;;  %v1011_v50 = vpop.xlane.xlu0 %1010 }
 0x174   : > { %v2875_v53 = vmax.f32 %v2861_v43, %v1008_v49  ;;  %v2878_v54 = vmax.f32 %v2863_v46, %v1011_v50 }
 0x176   : > { %v1056_v58 = vsub.f32 %v2861_v43, %v2875_v53  ;;  %1741 = vst.msk [vmem:[#allocation2 + $0x38] sm:$0xff] %vm421_vm3, %v2875_v53  ;;  %1742 = vst.msk [vmem:[#allocation2 + $0x40] sm:$0xff] %vm421_vm3, %v2878_v54  ;;  %1129 = vperm.xlu1 %2374, %v2859_v42   ;;  %v3234_v43 = vsub.f32 %v2832_v25, %v2844_v31 }
 0x177   : > { %v1014_v61 = vpop.xlane.xlu1 %1013  ;;  %v1017_v62 = vpop.xlane.xlu0 %1016 }
 0x178   : > { %v2895_v1 = vmax.f32 %v2880_v55, %v1014_v61  ;;  %v2900_v3 = vmax.f32 %v2882_v56, %v1017_v62 }
 0x17a   : > { %1743 = vst.msk [vmem:[#allocation2 + $0x48] sm:$0xff] %vm421_vm3, %v2895_v1  ;;  %1144 = vperm.xlu0 %2373, %v2895_v1   ;;  %1744 = vst.msk [vmem:[#allocation2 + $0x50] sm:$0xff] %vm421_vm3, %v2900_v3  ;;  %1124 = vperm.xlu1 %2374, %v2856_v41  }
 0x17b   : > { %v1020_v10 = vpop.xlane.xlu1 %1019  ;;  %v1023_v13 = vpop.xlane.xlu0 %1022 }
 0x17c   : > { %v2921_v14 = vmax.f32 %v2897_v2, %v1020_v10  ;;  %v2924_v21 = vmax.f32 %v2902_v4, %v1023_v13 }
 0x17e   : > { %1745 = vst.msk [vmem:[#allocation2 + $0x58] sm:$0xff] %vm421_vm3, %v2921_v14  ;;  %1154 = vperm.xlu0 %2373, %v2921_v14   ;;  %1746 = vst.msk [vmem:[#allocation2 + $0x60] sm:$0xff] %vm421_vm3, %v2924_v21  ;;  %1134 = vperm.xlu1 %2374, %v2875_v53   ;;  %v1073_v53 = vmul.f32 1.442695, %v3234_v43  ;;  %v3238_v31 = vsub.f32 %v2897_v2, %v2921_v14  ;;  %v3246_v43 = vsub.f32 %v2804_v12, %v2810_v16 }
 0x17f   : > { %v1026_v49 = vpop.xlane.xlu1 %1025  ;;  %v1029_v50 = vpop.xlane.xlu0 %1028 }
 0x180   : > { %v2941_v61 = vmax.f32 %v2926_v22, %v1026_v49  ;;  %v2944_v62 = vmax.f32 %v2928_v30, %v1029_v50 }
 0x182   : > { %1747 = vst.msk [vmem:[#allocation2 + $0x68] sm:$0xff] %vm421_vm3, %v2941_v61  ;;  %1164 = vperm.xlu0 %2373, %v2941_v61   ;;  %1748 = vst.msk [vmem:[#allocation2 + $0x70] sm:$0xff] %vm421_vm3, %v2944_v62  ;;  %1139 = vperm.xlu1 %2374, %v2878_v54  }
 0x183   : > { %v1032_v49 = vpop.xlane.xlu1 %1031 }
 0x184   : > { %v2959_v50 = vmax.f32 %v2946_v6, %v1032_v49  ;;  %v2972_v49 = vld [vmem:[%s2907_s8 + $0x18] sm:$0xff]  }
 0x185   : > { %2336 = vmatprep.subr.bf16.mxu1 %v2972_v49 }
 0x186   : > { %1749 = vst.msk [vmem:[#allocation2 + $0x78] sm:$0xff] %vm421_vm3, %v2959_v50  ;;  %1174 = vperm.xlu0 %2373, %v2959_v50   ;;  %1149 = vperm.xlu1 %2374, %v2900_v3  }
 0x18a   : > { %1159 = vperm.xlu1 %2374, %v2924_v21  }
 0x18e   : > { %1169 = vperm.xlu1 %2374, %v2944_v62  }
 0x1e1   : > { %v1100_v29 = vpop.permute.xlu0 %1099  ;;  %v1110_v8 = vpop.permute.xlu1 %1109 }
 0x1e2   : > { %v1177_v10 = vsub.f32 %v2738_v26, %v1100_v29  ;;  %v1179_v47 = vsub.f32 %v2740_v27, %v1110_v8 }
 0x1e4   : > { %v1193_v18 = vmul.f32 1.442695, %v1177_v10  ;;  %v1197_v20 = vmul.f32 1.442695, %v1179_v47 }
 0x1e5   : > { %v1105_v40 = vpop.permute.xlu1 %1104 }
 0x1e6   : > { %v1178_v37 = vsub.f32 %v2746_v32, %v1105_v40  ;;  %2395 = vpow2.f32 %v1193_v18 }
 0x1e8   : > { %v1195_v60 = vmul.f32 1.442695, %v1178_v37 }
 0x1e9   : > { %v1115_v48 = vpop.permute.xlu1 %1114 }
 0x1ea   : > { %2397 = vpow2.f32 %v1195_v60  ;;  %v1180_v13 = vsub.f32 %v2748_v33, %v1115_v48 }
 0x1eb   : > { %2399 = vpow2.f32 %v1197_v20 }
 0x1ec   : > { %v1199_v36 = vmul.f32 1.442695, %v1180_v13 }
 0x1ed   : > { %v1120_v9 = vpop.permute.xlu1 %1119 }
 0x1ee   : > { %2401 = vpow2.f32 %v1199_v36  ;;  %v1181_v26 = vsub.f32 %v2754_v38, %v1120_v9 }
 0x1f0   : > { %v1201_v29 = vmul.f32 1.442695, %v1181_v26 }
 0x1f1   : > { %v1130_v10 = vpop.permute.xlu1 %1129 }
 0x1f2   : > { %2403 = vpow2.f32 %v1201_v29  ;;  %v1183_v27 = vsub.f32 %v2756_v39, %v1130_v10 }
 0x1f3   : > { %v2981_v18 = vpop.eup %2395 }
 0x1f4   : > { %v1205_v8 = vmul.f32 1.442695, %v1183_v27 }
 0x1f5   : > { %v1145_v32 = vpop.permute.xlu0 %1144  ;;  %v1125_v37 = vpop.permute.xlu1 %1124 }
 0x1f6   : > { %2405 = vpow2.f32 %v1205_v8  ;;  %v1182_v47 = vsub.f32 %v2762_v44, %v1125_v37  ;;  %v1186_v48 = vsub.f32 %v2778_v57, %v1145_v32 }
 0x1f7   : > { %v2984_v33 = vpop.eup %2397 }
 0x1f8   : > { %v1203_v36 = vmul.f32 1.442695, %v1182_v47  ;;  %v1338_v38 = vpack.c.bf16 %v2984_v33, %v2981_v18  ;;  %v2990_v40 = vpop.eup %2399  ;;  %v1211_v26 = vmul.f32 1.442695, %v1186_v48 }
 0x1f9   : > { %v1155_v60 = vpop.permute.xlu0 %1154  ;;  %v1135_v39 = vpop.permute.xlu1 %1134 }
 0x1fa   : > { %v1188_v9 = vsub.f32 %v2782_v59, %v1155_v60  ;;  %2407 = vpow2.f32 %v1203_v36  ;;  %v1184_v13 = vsub.f32 %v2764_v45, %v1135_v39  ;;  %2320 = vmatprep.mubr.msk.bf16.mxu0 %vm454_vm2, %v1338_v38 }
 0x1fb   : > { %v2994_v44 = vpop.eup %2401 }
 0x1fc   : > { %v1215_v20 = vmul.f32 1.442695, %v1188_v9  ;;  %v1207_v57 = vmul.f32 1.442695, %v1184_v13  ;;  %v1339_v10 = vpack.c.bf16 %v2994_v44, %v2990_v40 }
 0x1fd   : > { %v1165_v29 = vpop.permute.xlu0 %1164  ;;  %v1140_v27 = vpop.permute.xlu1 %1139 }
 0x1fe   : > { %2409 = vpow2.f32 %v1215_v20  ;;  %v1185_v59 = vsub.f32 %v2770_v51, %v1140_v27  ;;  %2321 = vmatmul.mubr.msk.bf16.vlgmr.msra.gmra.mxu0 %vm454_vm2, %v1339_v10  ;;  %v1190_v45 = vsub.f32 %v2794_v5, %v1165_v29 }
 0x1ff   : > { %2411 = vpow2.f32 %v1207_v57  ;;  %v2404_v8 = vpop.eup %2403  ;;  %2331 = vmatpush3.bf16.msra.mxu0 %v2393_v28 }
 0x200   : > { %2413 = vpow2.f32 %v1211_v26  ;;  %v1209_v32 = vmul.f32 1.442695, %v1185_v59  ;;  %v1269_v47 = vsel %vm454_vm2, %v2404_v8, 0.0  ;;  %v1219_v9 = vmul.f32 1.442695, %v1190_v45 }
 0x201   : > { %v1175_v37 = vpop.permute.xlu0 %1174  ;;  %1270 = vadd.xlane.f32.xlu0 %v1269_v47  ;;  %v1150_v36 = vpop.permute.xlu1 %1149 }
 0x202   : > { %v1192_v48 = vsub.f32 %v2798_v7, %v1175_v37  ;;  %2415 = vpow2.f32 %v1209_v32  ;;  %v1187_v60 = vsub.f32 %v2772_v52, %v1150_v36 }
 0x203   : > { %v2406_v38 = vpop.eup %2405 }
 0x204   : > { %v1223_v51 = vmul.f32 1.442695, %v1192_v48  ;;  %v1213_v39 = vmul.f32 1.442695, %v1187_v60  ;;  %v1275_v28 = vsel %vm454_vm2, %v2406_v38, 0.0 }
 0x205   : > { %1276 = vadd.xlane.f32.xlu1 %v1275_v28  ;;  %v1160_v5 = vpop.permute.xlu1 %1159 }
 0x206   : > { %2417 = vpow2.f32 %v1223_v51  ;;  %v1189_v13 = vsub.f32 %v2786_v63, %v1160_v5 }
 0x207   : > { %2419 = vpow2.f32 %v1213_v39  ;;  %v2408_v20 = vpop.eup %2407 }
 0x208   : > { %2421 = vpow2.f32 %v1219_v9  ;;  %v1217_v7 = vmul.f32 1.442695, %v1189_v13  ;;  %v1272_v26 = vsel %vm454_vm2, %v2408_v20, 0.0  ;;  %v1340_v57 = vpack.c.bf16 %v2408_v20, %v2404_v8 }
 0x209   : > { %1273 = vadd.xlane.f32.xlu1 %v1272_v26  ;;  %v1170_v52 = vpop.permute.xlu1 %1169  ;;  %v1266_v20 = vsel %vm454_vm2, %v2994_v44, 0.0  ;;  %v3233_v44 = vsub.f32 %v2882_v56, %v2900_v3  ;;  %v3236_v56 = vsub.f32 %v2848_v35, %v2859_v42  ;;  %v3240_v35 = vsub.f32 %v2846_v34, %v2856_v41 }
 0x20a   : > { %2423 = vpow2.f32 %v1217_v7  ;;  %v1191_v10 = vsub.f32 %v2788_v0, %v1170_v52  ;;  %2326 = vmatprep.mubr.msk.bf16.mxu1 %vm454_vm2, %v1340_v57  ;;  %v1079_v57 = vmul.f32 1.442695, %v1056_v58  ;;  %v1260_v52 = vsel %vm454_vm2, %v2984_v33, 0.0 }
 0x20b   : > { %v2410_v29 = vpop.eup %2409  ;;  %v1257_v58 = vsel %vm454_vm2, %v2981_v18, 0.0  ;;  %v3235_v33 = vsub.f32 %v2928_v30, %v2944_v62  ;;  %v1077_v3 = vmul.f32 1.442695, %v3236_v56  ;;  %v1087_v18 = vmul.f32 1.442695, %v3238_v31 }
 0x20c   : > { %v2412_v27 = vpop.eup %2411  ;;  %v1290_v59 = vsel %vm454_vm2, %v2410_v29, 0.0  ;;  %v1221_v45 = vmul.f32 1.442695, %v1191_v10  ;;  %v1085_v10 = vmul.f32 1.442695, %v3233_v44  ;;  %v3239_v30 = vsub.f32 %v2902_v4, %v2924_v21 }
 0x20d   : > { %v1278_v63 = vsel %vm454_vm2, %v2412_v27, 0.0  ;;  %v1341_v32 = vpack.c.bf16 %v2412_v27, %v2406_v38  ;;  %v2414_v37 = vpop.eup %2413  ;;  %1291 = vadd.xlane.f32.xlu1 %v1290_v59  ;;  %v1263_v27 = vsel %vm454_vm2, %v2990_v40, 0.0  ;;  %v1093_v59 = vmul.f32 1.442695, %v3235_v33  ;;  %v1235_v33 = vld [vmem:[#allocation3 + $0x50] sm:$0xff] }
 0x20e   : > { %1279 = vadd.xlane.f32.xlu0 %v1278_v63  ;;  %2425 = vpow2.f32 %v1221_v45  ;;  %v1284_v0 = vsel %vm454_vm2, %v2414_v37, 0.0  ;;  %v3237_v40 = vsub.f32 %v2863_v46, %v2878_v54  ;;  %v1089_v62 = vmul.f32 1.442695, %v3239_v30  ;;  %v1238_v30 = vld [vmem:[#allocation3 + $0x68] sm:$0xff] }
 0x20f   : > { %2327 = vmatmul.mubr.msk.bf16.vlgmr.msra.gmra.mxu1 %vm454_vm2, %v1341_v32  ;;  %v2416_v8 = vpop.eup %2415  ;;  %2427 = vpow2.f32 %v1079_v57  ;;  %v1075_v42 = vmul.f32 1.442695, %v3240_v35  ;;  %v3241_v54 = vsub.f32 %v2946_v6, %v2959_v50  ;;  %v3242_v4 = vsub.f32 %v2880_v55, %v2895_v1 }
 0x210   : > { %2337 = vmatpush3.bf16.msra.mxu1 %v2972_v49  ;;  %v1342_v47 = vpack.c.bf16 %v2414_v37, %v2416_v8  ;;  %v1281_v28 = vsel %vm454_vm2, %v2416_v8, 0.0  ;;  %2429 = vpow2.f32 %v1085_v10  ;;  %v1081_v45 = vmul.f32 1.442695, %v3237_v40 }
 0x211   : > { %1285 = vadd.xlane.f32.xlu1 %v1284_v0  ;;  %2431 = vpow2.f32 %v1073_v53  ;;  %v1095_v2 = vmul.f32 1.442695, %v3241_v54  ;;  %v1083_v21 = vmul.f32 1.442695, %v3242_v4  ;;  %v3243_v32 = vsub.f32 %v2926_v22, %v2941_v61  ;;  %v1228_v4 = vld [vmem:[#allocation3 + $0x18] sm:$0xff] }
 0x212   : > { %2332 = vmatprep.mubr.msk.bf16.mxu0 %vm454_vm2, %v1342_v47  ;;  %2433 = vpow2.f32 %v1093_v59  ;;  %v1229_v47 = vld [vmem:[#allocation3 + $0x20] sm:$0xff]  ;;  %v1069_v53 = vmul.f32 1.442695, %v3246_v43  ;;  %v1240_v59 = vld [vmem:[#allocation3 + $0x78] sm:$0xff]  ;;  %v3247_v40 = vsub.f32 %v2802_v11, %v2807_v15 }
 0x213   : > { %v2418_v48 = vpop.eup %2417  ;;  %2435 = vpow2.f32 %v1077_v3  ;;  %v1091_v6 = vmul.f32 1.442695, %v3243_v32 }
 0x214   : > { %v2420_v36 = vpop.eup %2419  ;;  %v1302_v60 = vsel %vm454_vm2, %v2418_v48, 0.0  ;;  %2437 = vpow2.f32 %v1081_v45  ;;  %v1065_v45 = vmul.f32 1.442695, %v3247_v40 }
 0x215   : > { %v1287_v38 = vsel %vm454_vm2, %v2420_v36, 0.0  ;;  %v1343_v51 = vpack.c.bf16 %v2410_v29, %v2420_v36  ;;  %v2422_v9 = vpop.eup %2421  ;;  %1303 = vadd.xlane.f32.xlu1 %v1302_v60  ;;  %2439 = vpow2.f32 %v1087_v18  ;;  %v1233_v18 = vld [vmem:[#allocation3 + $0x40] sm:$0xff] }
 0x216   : > { %1288 = vadd.xlane.f32.xlu0 %v1287_v38  ;;  %v1296_v49 = vsel %vm454_vm2, %v2422_v9, 0.0  ;;  %2441 = vpow2.f32 %v1089_v62 }
 0x217   : > { %2333 = vmatmul.mubr.msk.bf16.vlgmr.msra.gmra.mxu0 %vm454_vm2, %v1343_v51  ;;  %v2424_v39 = vpop.eup %2423  ;;  %2443 = vpow2.f32 %v1075_v42  ;;  %v1230_v51 = vld [vmem:[#allocation3 + $0x28] sm:$0xff] }
 0x218   : > { %v1344_v5 = vpack.c.bf16 %v2422_v9, %v2424_v39  ;;  %v1293_v29 = vsel %vm454_vm2, %v2424_v39, 0.0  ;;  %2445 = vpow2.f32 %v1095_v2  ;;  %v3244_v39 = vsub.f32 %v2819_v19, %v2830_v24  ;;  %v1234_v19 = vld [vmem:[#allocation3 + $0x48] sm:$0xff]  ;;  %v1239_v2 = vld [vmem:[#allocation3 + $0x70] sm:$0xff] }
 0x219   : > { %1297 = vadd.xlane.f32.xlu1 %v1296_v49  ;;  %2447 = vpow2.f32 %v1083_v21 }
 0x21a   : > { %1282 = vadd.xlane.f32.xlu0 %v1281_v28  ;;  %2338 = vmatprep.mubr.msk.bf16.mxu1 %vm454_vm2, %v1344_v5  ;;  %2449 = vpow2.f32 %v1091_v6  ;;  %v1071_v49 = vmul.f32 1.442695, %v3244_v39 }
 0x21b   : > { %v2426_v13 = vpop.eup %2425 }
 0x21c   : > { %v1299_v7 = vsel %vm454_vm2, %v2426_v13, 0.0  ;;  %v1345_v26 = vpack.c.bf16 %v2418_v48, %v2426_v13  ;;  %v2428_v25 = vpop.eup %2427  ;;  %v1231_v48 = vld [vmem:[#allocation3 + $0x30] sm:$0xff]  ;;  %v1232_v13 = vld [vmem:[#allocation3 + $0x38] sm:$0xff]  ;;  %2451 = vpow2.f32 %v1071_v49 }
 0x21d   : > { %1267 = vadd.xlane.f32.xlu1 %v1266_v20  ;;  %v3056_v63 = vpop.eup %2429  ;;  %v1236_v20 = vld [vmem:[#allocation3 + $0x58] sm:$0xff] }
 0x21e   : > { %1300 = vadd.xlane.f32.xlu0 %v1299_v7  ;;  %2339 = vmatmul.mubr.msk.bf16.vlgmr.msra.gmra.mxu1 %vm454_vm2, %v1345_v26  ;;  %v2432_v46 = vpop.eup %2431  ;;  %v3245_v26 = vsub.f32 %v2812_v17, %v2827_v23  ;;  %v1251_v12 = vmul.f32 %v3056_v63, %v1235_v33 }
 0x21f   : > { %v3065_v14 = vpop.eup %2433  ;;  %v1245_v22 = vmul.f32 %v2432_v46, %v1229_v47  ;;  %v1237_v47 = vld [vmem:[#allocation3 + $0x60] sm:$0xff] }
 0x220   : > { %v2436_v34 = vpop.eup %2435  ;;  %v1067_v57 = vmul.f32 1.442695, %v3245_v26 }
 0x221   : > { %1261 = vadd.xlane.f32.xlu1 %v1260_v52  ;;  %v3071_v41 = vpop.eup %2437  ;;  %v1247_v60 = vmul.f32 %v2436_v34, %v1231_v48  ;;  %v1248_v52 = vmul.f32 %v2428_v25, %v1232_v13 }
 0x222   : > { %1294 = vadd.xlane.f32.xlu0 %v1293_v29  ;;  %v2440_v50 = vpop.eup %2439  ;;  %2453 = vpow2.f32 %v1067_v57  ;;  %v1249_v11 = vmul.f32 %v3071_v41, %v1233_v18 }
 0x223   : > { %v3077_v37 = vpop.eup %2441  ;;  %v1252_v29 = vmul.f32 %v2440_v50, %v1236_v20 }
 0x224   : > { %v2444_v55 = vpop.eup %2443 }
 0x225   : > { %v2446_v1 = vpop.eup %2445  ;;  %v1246_v28 = vmul.f32 %v2444_v55, %v1230_v51 }
 0x226   : > { %1264 = vadd.xlane.f32.xlu0 %v1263_v27  ;;  %v2448_v8 = vpop.eup %2447  ;;  %v1256_v16 = vmul.f32 %v2446_v1, %v1240_v59 }
 0x227   : > { %v2450_v0 = vpop.eup %2449  ;;  %v1250_v17 = vmul.f32 %v2448_v8, %v1234_v19 }
 0x228   : > { %v1254_v15 = vmul.f32 %v2450_v0, %v1238_v30 }
 0x22a   : > { %1258 = vadd.xlane.f32.xlu0 %v1257_v58 }
 0x232   : > { %1643 = vperm.xlu1 %2374, %v2428_v25  }
 0x236   : > { %1658 = vperm.xlu1 %2374, %v3056_v63  }
 0x23a   : > { %1628 = vperm.xlu1 %2374, %v2432_v46   ;;  %v3102_v46 = vpop.eup %2451 }
 0x23b   : > { %v3104_v6 = vpop.eup %2453 }
 0x23e   : > { %1678 = vperm.xlu1 %2374, %v3065_v14  }
 0x240   : > { %1638 = vperm.xlu0 %2373, %v2436_v34  }
 0x242   : > { %1648 = vperm.xlu1 %2374, %v3071_v41   ;;  %v1244_v41 = vmul.f32 %v3102_v46, %v1228_v4 }
 0x244   : > { %1663 = vperm.xlu0 %2373, %v2440_v50   ;;  %v1255_v50 = vmul.f32 %v3065_v14, %v1239_v2  ;;  %v1253_v14 = vmul.f32 %v3077_v37, %v1237_v47 }
 0x246   : > { %1668 = vperm.xlu1 %2374, %v3077_v37  }
 0x248   : > { %1633 = vperm.xlu0 %2373, %v2444_v55  }
 0x24c   : > { %1683 = vperm.xlu0 %2373, %v2446_v1  }
 0x250   : > { %1653 = vperm.xlu0 %2373, %v2448_v8  }
 0x254   : > { %1673 = vperm.xlu0 %2373, %v2450_v0  }
 0x28a   : > { %v1271_v61 = vpop.xlane.xlu0 %1270 }
 0x28b   : > { %v1309_v36 = vadd.f32 %v1271_v61, %v1245_v22  ;;  %v1226_v22 = vld [vmem:[#allocation3 + $0x8] sm:$0xff] }
 0x28d   : > { %1326 = vst.msk [vmem:[#allocation3 + $0x20] sm:$0xff] %vm421_vm3, %v1309_v36 }
 0x28e   : > { %v1277_v38 = vpop.xlane.xlu1 %1276 }
 0x28f   : > { %v1311_v9 = vadd.f32 %v1277_v38, %v1247_v60  ;;  %v1242_v38 = vmul.f32 %v3104_v6, %v1226_v22 }
 0x291   : > { %1328 = vst.msk [vmem:[#allocation3 + $0x30] sm:$0xff] %vm421_vm3, %v1311_v9 }
 0x292   : > { %v1274_v5 = vpop.xlane.xlu1 %1273 }
 0x293   : > { %v1310_v7 = vadd.f32 %v1274_v5, %v1246_v28  ;;  %v1227_v28 = vld [vmem:[#allocation3 + $0x10] sm:$0xff] }
 0x294   : > { %v1774_v56 = vld [vmem:[#allocation3 + $0x20] sm:$0xff] }
 0x295   : > { %1327 = vst.msk [vmem:[#allocation3 + $0x28] sm:$0xff] %vm421_vm3, %v1310_v7 }
 0x296   : > { %v1292_v10 = vpop.xlane.xlu1 %1291 }
 0x297   : > { %v1280_v44 = vpop.xlane.xlu0 %1279  ;;  %v1316_v27 = vadd.f32 %v1292_v10, %v1252_v29  ;;  %v1225_v29 = vld [vmem:[#allocation3] sm:$0xff] }
 0x298   : > { %v1312_v24 = vadd.f32 %v1280_v44, %v1248_v52  ;;  %v1776_v58 = vld [vmem:[#allocation3 + $0x30] sm:$0xff] }
 0x299   : > { %1333 = vst.msk [vmem:[#allocation3 + $0x58] sm:$0xff] %vm421_vm3, %v1316_v27  ;;  %2455 = vrcp.f32 %v1776_v58 }
 0x29a   : > { %1329 = vst.msk [vmem:[#allocation3 + $0x38] sm:$0xff] %vm421_vm3, %v1312_v24  ;;  %v1286_v23 = vpop.xlane.xlu1 %1285  ;;  %2457 = vpow2.f32 %v1069_v53 }
 0x29b   : > { %v1314_v3 = vadd.f32 %v1286_v23, %v1250_v17  ;;  %2459 = vrcp.f32 %v1774_v56 }
 0x29c   : > { %2461 = vpow2.f32 %v1065_v45  ;;  %v1775_v21 = vld [vmem:[#allocation3 + $0x28] sm:$0xff] }
 0x29d   : > { %1331 = vst.msk [vmem:[#allocation3 + $0x48] sm:$0xff] %vm421_vm3, %v1314_v3 }
 0x29e   : > { %v1304_v31 = vpop.xlane.xlu1 %1303 }
 0x29f   : > { %v1289_v25 = vpop.xlane.xlu0 %1288  ;;  %v1320_v35 = vadd.f32 %v1304_v31, %v1256_v16 }
 0x2a0   : > { %v1315_v62 = vadd.f32 %v1289_v25, %v1251_v12  ;;  %v1781_v55 = vld [vmem:[#allocation3 + $0x58] sm:$0xff] }
 0x2a1   : > { %v1777_v42 = vld [vmem:[#allocation3 + $0x38] sm:$0xff]  ;;  %1337 = vst.msk [vmem:[#allocation3 + $0x78] sm:$0xff] %vm421_vm3, %v1320_v35 }
 0x2a2   : > { %1332 = vst.msk [vmem:[#allocation3 + $0x50] sm:$0xff] %vm421_vm3, %v1315_v62  ;;  %2463 = vrcp.f32 %v1777_v42  ;;  %v1298_v54 = vpop.xlane.xlu1 %1297 }
 0x2a3   : > { %v1283_v63 = vpop.xlane.xlu0 %1282  ;;  %v1318_v32 = vadd.f32 %v1298_v54, %v1254_v15  ;;  %2465 = vrcp.f32 %v1775_v21  ;;  %v1596_v15 = vld [vmem:[#allocation4 + $0x30] sm:$0xff] }
 0x2a4   : > { %v1313_v34 = vadd.f32 %v1283_v63, %v1249_v11  ;;  %2467 = vrcp.f32 %v1781_v55  ;;  %v1779_v51 = vld [vmem:[#allocation3 + $0x48] sm:$0xff]  ;;  %v1594_v63 = vld [vmem:[#allocation4 + $0x20] sm:$0xff] }
 0x2a5   : > { %1335 = vst.msk [vmem:[#allocation3 + $0x68] sm:$0xff] %vm421_vm3, %v1318_v32 }
 0x2a6   : > { %1330 = vst.msk [vmem:[#allocation3 + $0x40] sm:$0xff] %vm421_vm3, %v1313_v34  ;;  %v2456_v1 = vpop.eup %2455  ;;  %v1268_v0 = vpop.xlane.xlu1 %1267 }
 0x2a7   : > { %v1301_v8 = vpop.xlane.xlu0 %1300  ;;  %v1308_v48 = vadd.f32 %v1268_v0, %v1244_v41  ;;  %1834 = vperm.xlu1 %2374, %v2456_v1   ;;  %v3110_v60 = vpop.eup %2457 }
 0x2a8   : > { %v1319_v61 = vadd.f32 %v1301_v8, %v1255_v50  ;;  %v2460_v9 = vpop.eup %2459  ;;  %v1243_v37 = vmul.f32 %v3110_v60, %v1227_v28  ;;  %v1785_v26 = vld [vmem:[#allocation3 + $0x78] sm:$0xff] }
 0x2a9   : > { %v1780_v36 = vld [vmem:[#allocation3 + $0x50] sm:$0xff]  ;;  %1325 = vst.msk [vmem:[#allocation3 + $0x18] sm:$0xff] %vm421_vm3, %v1308_v48  ;;  %v2462_v7 = vpop.eup %2461  ;;  %v1597_v50 = vld [vmem:[#allocation4 + $0x38] sm:$0xff] }
 0x2aa   : > { %1336 = vst.msk [vmem:[#allocation3 + $0x70] sm:$0xff] %vm421_vm3, %v1319_v61  ;;  %2469 = vrcp.f32 %v1780_v36  ;;  %v1262_v49 = vpop.xlane.xlu1 %1261  ;;  %v1241_v19 = vmul.f32 %v2462_v7, %v1225_v29  ;;  %v1600_v48 = vld [vmem:[#allocation4 + $0x50] sm:$0xff] }
 0x2ab   : > { %v1295_v39 = vpop.xlane.xlu0 %1294  ;;  %v1306_v13 = vadd.f32 %v1262_v49, %v1242_v38  ;;  %1824 = vperm.xlu1 %2374, %v2460_v9   ;;  %2471 = vrcp.f32 %v1779_v51  ;;  %v1598_v9 = vld [vmem:[#allocation4 + $0x40] sm:$0xff] }
 0x2ac   : > { %v1317_v5 = vadd.f32 %v1295_v39, %v1253_v14  ;;  %v1783_v24 = vld [vmem:[#allocation3 + $0x68] sm:$0xff] }
 0x2ad   : > { %v1778_v20 = vld [vmem:[#allocation3 + $0x40] sm:$0xff]  ;;  %1323 = vst.msk [vmem:[#allocation3 + $0x8] sm:$0xff] %vm421_vm3, %v1306_v13  ;;  %v1601_v13 = vld [vmem:[#allocation4 + $0x58] sm:$0xff] }
 0x2ae   : > { %1334 = vst.msk [vmem:[#allocation3 + $0x60] sm:$0xff] %vm421_vm3, %v1317_v5  ;;  %2473 = vrcp.f32 %v1778_v20  ;;  %v1644_v56 = vpop.permute.xlu1 %1643 }
 0x2af   : > { %v2464_v57 = vpop.eup %2463  ;;  %v1265_v52 = vpop.xlane.xlu0 %1264  ;;  %2475 = vrcp.f32 %v1785_v26  ;;  %v1599_v26 = vld [vmem:[#allocation4 + $0x48] sm:$0xff] }
 0x2b0   : > { %v1307_v44 = vadd.f32 %v1265_v52, %v1243_v37  ;;  %1839 = vperm.xlu0 %2373, %v2464_v57   ;;  %v2466_v27 = vpop.eup %2465  ;;  %v1773_v40 = vld [vmem:[#allocation3 + $0x18] sm:$0xff] }
 0x2b1   : > { %v1784_v10 = vld [vmem:[#allocation3 + $0x70] sm:$0xff]  ;;  %v2468_v17 = vpop.eup %2467 }
 0x2b2   : > { %1324 = vst.msk [vmem:[#allocation3 + $0x10] sm:$0xff] %vm421_vm3, %v1307_v44  ;;  %2477 = vrcp.f32 %v1784_v10  ;;  %v1659_v31 = vpop.permute.xlu1 %1658  ;;  %v1604_v10 = vld [vmem:[#allocation4 + $0x70] sm:$0xff] }
 0x2b3   : > { %v1259_v43 = vpop.xlane.xlu0 %1258  ;;  %2479 = vrcp.f32 %v1783_v24  ;;  %v1696_v28 = vmul.f32 %v1659_v31, %v1600_v48 }
 0x2b4   : > { %v1305_v53 = vadd.f32 %v1259_v43, %v1241_v19  ;;  %1829 = vperm.xlu0 %2373, %v2466_v27   ;;  %v1771_v18 = vld [vmem:[#allocation3 + $0x8] sm:$0xff]  ;;  %v1602_v43 = vld [vmem:[#allocation4 + $0x60] sm:$0xff] }
 0x2b5   : > { %v1782_v58 = vld [vmem:[#allocation3 + $0x60] sm:$0xff] }
 0x2b6   : > { %1322 = vst.msk [vmem:[#allocation3] sm:$0xff] %vm421_vm3, %v1305_v53  ;;  %2481 = vrcp.f32 %v1782_v58  ;;  %v1629_v42 = vpop.permute.xlu1 %1628 }
 0x2b7   : > { %v2470_v23 = vpop.eup %2469  ;;  %2483 = vrcp.f32 %v1773_v40  ;;  %v1690_v55 = vmul.f32 %v1629_v42, %v1594_v63  ;;  %v1603_v40 = vld [vmem:[#allocation4 + $0x68] sm:$0xff] }
 0x2b8   : > { %1854 = vperm.xlu1 %2374, %v2470_v23   ;;  %1859 = vperm.xlu0 %2373, %v2468_v17   ;;  %v2472_v33 = vpop.eup %2471 }
 0x2b9   : > { %v1772_v12 = vld [vmem:[#allocation3 + $0x10] sm:$0xff] }
 0x2ba   : > { %2485 = vrcp.f32 %v1772_v12  ;;  %v1679_v34 = vpop.permute.xlu1 %1678 }
 0x2bb   : > { %v2474_v59 = vpop.eup %2473  ;;  %v1639_v16 = vpop.permute.xlu0 %1638  ;;  %2487 = vrcp.f32 %v1771_v18  ;;  %v1700_v17 = vmul.f32 %v1679_v34, %v1604_v10 }
 0x2bc   : > { %1844 = vperm.xlu1 %2374, %v2474_v59   ;;  %1849 = vperm.xlu0 %2373, %v2472_v33   ;;  %v2476_v3 = vpop.eup %2475  ;;  %v1692_v21 = vmul.f32 %v1639_v16, %v1596_v15  ;;  %v1605_v33 = vld [vmem:[#allocation4 + $0x78] sm:$0xff] }
 0x2bd   : > { %v1770_v62 = vld [vmem:[#allocation3] sm:$0xff] }
 0x2be   : > { %2489 = vrcp.f32 %v1770_v62  ;;  %v3123_v11 = vpop.f32.mrf.mxu0  ;;  %v1649_v14 = vpop.permute.xlu1 %1648 }
 0x2bf   : > { %v2478_v45 = vpop.eup %2477  ;;  %v1664_v35 = vpop.permute.xlu0 %1663 }
 0x2c0   : > { %1874 = vperm.xlu1 %2374, %v2478_v45   ;;  %1879 = vperm.xlu0 %2373, %v2476_v3   ;;  %v2480_v25 = vpop.eup %2479  ;;  %v3126_v54 = vpop.f32.mrf.mxu0  ;;  %v1697_v29 = vmul.f32 %v1664_v35, %v1601_v13 }
 0x2c2   : > { %v3128_v8 = vpop.f32.mrf.mxu0  ;;  %v1669_v53 = vpop.permute.xlu1 %1668 }
 0x2c3   : > { %v2482_v30 = vpop.eup %2481  ;;  %v1634_v2 = vpop.permute.xlu0 %1633 }
 0x2c4   : > { %1864 = vperm.xlu1 %2374, %v2482_v30   ;;  %1869 = vperm.xlu0 %2373, %v2480_v25   ;;  %v2484_v4 = vpop.eup %2483  ;;  %v3132_v39 = vpop.f32.mrf.mxu0 }
 0x2c7   : > { %v2486_v32 = vpop.eup %2485  ;;  %v1684_v36 = vpop.permute.xlu0 %1683 }
 0x2c8   : > { %1618 = vperm.xlu1 %2374, %v3110_v60   ;;  %1623 = vperm.xlu0 %2373, %v3102_v46   ;;  %v1595_v46 = vld [vmem:[#allocation4 + $0x28] sm:$0xff]  ;;  %v2488_v47 = vpop.eup %2487  ;;  %v1701_v16 = vmul.f32 %v1684_v36, %v1605_v33 }
 0x2c9   : > { %v1691_v38 = vmul.f32 %v1634_v2, %v1595_v46  ;;  %v3144_v2 = vstv %s1753_s9 }
 0x2cb   : > { %v2490_v61 = vpop.eup %2489  ;;  %v1654_v57 = vpop.permute.xlu0 %1653 }
 0x2cc   : > { %1608 = vperm.xlu1 %2374, %v2462_v7   ;;  %1613 = vperm.xlu0 %2373, %v3104_v6   ;;  %v1693_v6 = vmul.f32 %v1644_v56, %v1597_v50  ;;  %v1694_v7 = vmul.f32 %v1649_v14, %v1598_v9  ;;  %v1695_v24 = vmul.f32 %v1654_v57, %v1599_v26 }
 0x2cd   : > { %v1698_v56 = vmul.f32 %v1669_v53, %v1602_v43 }
 0x2cf   : > { %v2328_v41 = vpop.f32.mrf.mxu1  ;;  %v1674_v45 = vpop.permute.xlu0 %1673 }
 0x2d0   : > { %v1708_v1 = vadd.f32 %v2328_v41, %v1692_v21  ;;  %1814 = vperm.xlu1 %2374, %v2486_v32   ;;  %1819 = vperm.xlu0 %2373, %v2484_v4   ;;  %v1699_v18 = vmul.f32 %v1674_v45, %v1603_v40 }
 0x2d1   : > { %v1453_v0 = vpop.f32.mrf.mxu1 }
 0x2d2   : > { %1724 = vst.msk [vmem:[#allocation4 + $0x30] sm:$0xff] %vm454_vm2, %v1708_v1  ;;  %v1706_v22 = vadd.f32 %v1690_v55, %v1453_v0 }
 0x2d3   : > { %v2329_v60 = vpop.f32.mrf.mxu1 }
 0x2d4   : > { %1722 = vst.msk [vmem:[#allocation4 + $0x20] sm:$0xff] %vm454_vm2, %v1706_v22  ;;  %v1709_v51 = vadd.f32 %v2329_v60, %v1693_v6  ;;  %1804 = vperm.xlu1 %2374, %v2490_v61   ;;  %1809 = vperm.xlu0 %2373, %v2488_v47  }
 0x2d5   : > { %v1456_v49 = vpop.f32.mrf.mxu1 }
 0x2d6   : > { %1725 = vst.msk [vmem:[#allocation4 + $0x38] sm:$0xff] %vm454_vm2, %v1709_v51  ;;  %v1707_v5 = vadd.f32 %v1691_v38, %v1456_v49 }
 0x2d7   : > { %v2334_v20 = vpop.f32.mrf.mxu0 }
 0x2d8   : > { %1723 = vst.msk [vmem:[#allocation4 + $0x28] sm:$0xff] %vm454_vm2, %v1707_v5  ;;  %v1712_v37 = vadd.f32 %v2334_v20, %v1696_v28 }
 0x2d9   : > { %v1514_v52 = vpop.f32.mrf.mxu0  ;;  %v1760_v42 = vld [vmem:[#allocation4 + $0x30] sm:$0xff] }
 0x2da   : > { %1728 = vst.msk [vmem:[#allocation4 + $0x50] sm:$0xff] %vm454_vm2, %v1712_v37  ;;  %v1710_v44 = vadd.f32 %v1694_v7, %v1514_v52 }
 0x2db   : > { %v2335_v19 = vpop.f32.mrf.mxu0  ;;  %v1758_v4 = vld [vmem:[#allocation4 + $0x20] sm:$0xff] }
 0x2dc   : > { %1726 = vst.msk [vmem:[#allocation4 + $0x40] sm:$0xff] %vm454_vm2, %v1710_v44  ;;  %v1713_v27 = vadd.f32 %v2335_v19, %v1697_v29 }
 0x2dd   : > { %v1517_v58 = vpop.f32.mrf.mxu0  ;;  %v1761_v55 = vld [vmem:[#allocation4 + $0x38] sm:$0xff] }
 0x2de   : > { %1729 = vst.msk [vmem:[#allocation4 + $0x58] sm:$0xff] %vm454_vm2, %v1713_v27  ;;  %v1711_v23 = vadd.f32 %v1695_v24, %v1517_v58  ;;  %v2340_v59 = vpop.f32.mrf.mxu1 }
 0x2df   : > { %v1716_v3 = vadd.f32 %v2340_v59, %v1700_v17  ;;  %v1759_v47 = vld [vmem:[#allocation4 + $0x28] sm:$0xff] }
 0x2e0   : > { %1727 = vst.msk [vmem:[#allocation4 + $0x48] sm:$0xff] %vm454_vm2, %v1711_v23  ;;  %v1575_v12 = vpop.f32.mrf.mxu1 }
 0x2e1   : > { %1732 = vst.msk [vmem:[#allocation4 + $0x70] sm:$0xff] %vm454_vm2, %v1716_v3  ;;  %v1714_v25 = vadd.f32 %v1698_v56, %v1575_v12  ;;  %v1764_v38 = vld [vmem:[#allocation4 + $0x50] sm:$0xff] }
 0x2e2   : > { %v2341_v31 = vpop.f32.mrf.mxu1 }
 0x2e3   : > { %1730 = vst.msk [vmem:[#allocation4 + $0x60] sm:$0xff] %vm454_vm2, %v1714_v25  ;;  %v1717_v30 = vadd.f32 %v2341_v31, %v1701_v16  ;;  %v1762_v7 = vld [vmem:[#allocation4 + $0x40] sm:$0xff]  ;;  %v1593_v31 = vld [vmem:[#allocation4 + $0x18] sm:$0xff] }
 0x2e4   : > { %v1578_v62 = vpop.f32.mrf.mxu1 }
 0x2e5   : > { %1733 = vst.msk [vmem:[#allocation4 + $0x78] sm:$0xff] %vm454_vm2, %v1717_v30  ;;  %v1715_v35 = vadd.f32 %v1699_v18, %v1578_v62  ;;  %v1765_v60 = vld [vmem:[#allocation4 + $0x58] sm:$0xff]  ;;  %v1592_v18 = vld [vmem:[#allocation4 + $0x10] sm:$0xff] }
 0x2e7   : > { %1731 = vst.msk [vmem:[#allocation4 + $0x68] sm:$0xff] %vm454_vm2, %v1715_v35  ;;  %v1763_v13 = vld [vmem:[#allocation4 + $0x48] sm:$0xff] }
 0x2e8   : > { %v1768_v24 = vld [vmem:[#allocation4 + $0x70] sm:$0xff] }
 0x2ea   : > { %v1766_v3 = vld [vmem:[#allocation4 + $0x60] sm:$0xff] }
 0x2ec   : > { %v1769_v10 = vld [vmem:[#allocation4 + $0x78] sm:$0xff] }
 0x2ee   : > { %v1767_v59 = vld [vmem:[#allocation4 + $0x68] sm:$0xff] }
 0x322   : > { %v1835_v15 = vpop.permute.xlu1 %1834 }
 0x323   : > { %v1888_v63 = vmul.f32 %v1835_v15, %v1760_v42 }
 0x325   : > { %v1901_v34 = vmul.f32 %v3144_v2, %v1888_v63 }
 0x326   : > { %v1825_v21 = vpop.permute.xlu1 %1824 }
 0x327   : > { %v1886_v32 = vmul.f32 %v1825_v21, %v1758_v4 }
 0x329   : > { %v3147_v50 = vsub.f32 %v1886_v32, %v1901_v34  ;;  %v1591_v34 = vld [vmem:[#allocation4 + $0x8] sm:$0xff]  ;;  %v1590_v32 = vld [vmem:[#allocation4] sm:$0xff] }
 0x32b   : > { %v1840_v41 = vpop.permute.xlu0 %1839  ;;  %v1917_v46 = vmul.f32 %v3147_v50, %v3147_v50 }
 0x32c   : > { %v1889_v1 = vmul.f32 %v1840_v41, %v1761_v55 }
 0x32d   : > { %v1929_v0 = vsel %vm454_vm2, %v1917_v46, 0.0 }
 0x32e   : > { %1930 = vadd.xlane.f32.xlu1 %v1929_v0  ;;  %v1902_v22 = vmul.f32 %v3144_v2, %v1889_v1 }
 0x32f   : > { %v1830_v6 = vpop.permute.xlu0 %1829 }
 0x330   : > { %v1887_v61 = vmul.f32 %v1830_v6, %v1759_v47 }
 0x332   : > { %v3153_v48 = vsub.f32 %v1887_v61, %v1902_v22 }
 0x333   : > { %v1860_v36 = vpop.permute.xlu0 %1859  ;;  %v1855_v14 = vpop.permute.xlu1 %1854 }
 0x334   : > { %v1893_v51 = vmul.f32 %v1860_v36, %v1765_v60  ;;  %v1892_v9 = vmul.f32 %v1855_v14, %v1764_v38  ;;  %v1918_v49 = vmul.f32 %v3153_v48, %v3153_v48 }
 0x336   : > { %v1932_v28 = vsel %vm454_vm2, %v1918_v49, 0.0  ;;  %v1904_v37 = vmul.f32 %v3144_v2, %v1893_v51  ;;  %v1903_v26 = vmul.f32 %v3144_v2, %v1892_v9 }
 0x337   : > { %v1850_v5 = vpop.permute.xlu0 %1849  ;;  %1933 = vadd.xlane.f32.xlu0 %v1932_v28  ;;  %v1845_v20 = vpop.permute.xlu1 %1844 }
 0x338   : > { %v1891_v57 = vmul.f32 %v1850_v5, %v1763_v13  ;;  %v1890_v52 = vmul.f32 %v1845_v20, %v1762_v7 }
 0x33a   : > { %v3160_v29 = vsub.f32 %v1891_v57, %v1904_v37  ;;  %v3162_v44 = vsub.f32 %v1890_v52, %v1903_v26 }
 0x33b   : > { %v1880_v19 = vpop.permute.xlu0 %1879  ;;  %v1875_v27 = vpop.permute.xlu1 %1874 }
 0x33c   : > { %v1897_v43 = vmul.f32 %v1880_v19, %v1769_v10  ;;  %v1896_v53 = vmul.f32 %v1875_v27, %v1768_v24  ;;  %v1919_v58 = vmul.f32 %v3162_v44, %v3162_v44  ;;  %v1920_v17 = vmul.f32 %v3160_v29, %v3160_v29 }
 0x33e   : > { %v1935_v23 = vsel %vm454_vm2, %v1919_v58, 0.0  ;;  %v1938_v33 = vsel %vm454_vm2, %v1920_v17, 0.0  ;;  %v1906_v45 = vmul.f32 %v3144_v2, %v1897_v43  ;;  %v1905_v12 = vmul.f32 %v3144_v2, %v1896_v53 }
 0x33f   : > { %v1870_v56 = vpop.permute.xlu0 %1869  ;;  %v1865_v40 = vpop.permute.xlu1 %1864  ;;  %1936 = vadd.xlane.f32.xlu0 %v1935_v23  ;;  %1939 = vadd.xlane.f32.xlu1 %v1938_v33 }
 0x340   : > { %v1895_v16 = vmul.f32 %v1870_v56, %v1767_v59  ;;  %v1894_v25 = vmul.f32 %v1865_v40, %v1766_v3 }
 0x342   : > { %v3172_v30 = vsub.f32 %v1895_v16, %v1906_v45  ;;  %v3174_v62 = vsub.f32 %v1894_v25, %v1905_v12 }
 0x343   : > { %v1624_v35 = vpop.permute.xlu0 %1623  ;;  %v1619_v42 = vpop.permute.xlu1 %1618 }
 0x344   : > { %v1689_v15 = vmul.f32 %v1624_v35, %v1593_v31  ;;  %v1688_v63 = vmul.f32 %v1619_v42, %v1592_v18  ;;  %v1921_v4 = vmul.f32 %v3174_v62, %v3174_v62  ;;  %v1922_v21 = vmul.f32 %v3172_v30, %v3172_v30  ;;  %v2233_v18 = vld [vmem:[%s3231_s4] ss:$0 sm:$0xff] }
 0x346   : > { %v1705_v41 = vadd.f32 %v3128_v8, %v1689_v15  ;;  %v1704_v55 = vadd.f32 %v3123_v11, %v1688_v63  ;;  %v1941_v1 = vsel %vm454_vm2, %v1921_v4, 0.0  ;;  %v1944_v46 = vsel %vm454_vm2, %v1922_v21, 0.0 }
 0x347   : > { %v1614_v0 = vpop.permute.xlu0 %1613  ;;  %v1609_v47 = vpop.permute.xlu1 %1608  ;;  %1942 = vadd.xlane.f32.xlu0 %v1941_v1  ;;  %1945 = vadd.xlane.f32.xlu1 %v1944_v46 }
 0x348   : > { %1721 = vst.msk [vmem:[#allocation4 + $0x18] sm:$0xff] %vm454_vm2, %v1705_v41  ;;  %1720 = vst.msk [vmem:[#allocation4 + $0x10] sm:$0xff] %vm454_vm2, %v1704_v55  ;;  %v1687_v6 = vmul.f32 %v1614_v0, %v1591_v34  ;;  %v1686_v22 = vmul.f32 %v1609_v47, %v1590_v32 }
 0x34a   : > { %v1703_v61 = vadd.f32 %v1687_v6, %v3132_v39  ;;  %v1702_v8 = vadd.f32 %v1686_v22, %v3126_v54 }
 0x34b   : > { %v1820_v11 = vpop.permute.xlu0 %1819  ;;  %v1815_v36 = vpop.permute.xlu1 %1814 }
 0x34c   : > { %1719 = vst.msk [vmem:[#allocation4 + $0x8] sm:$0xff] %vm454_vm2, %v1703_v61  ;;  %1718 = vst.msk [vmem:[#allocation4] sm:$0xff] %vm454_vm2, %v1702_v8 }
 0x34f   : > { %v1757_v60 = vld [vmem:[#allocation4 + $0x18] sm:$0xff]  ;;  %v1756_v14 = vld [vmem:[#allocation4 + $0x10] sm:$0xff]  ;;  %v1810_v9 = vpop.permute.xlu0 %1809  ;;  %v1805_v28 = vpop.permute.xlu1 %1804 }
 0x350   : > { %v1885_v38 = vmul.f32 %v1820_v11, %v1757_v60  ;;  %v1884_v51 = vmul.f32 %v1815_v36, %v1756_v14 }
 0x352   : > { %v1900_v13 = vmul.f32 %v3144_v2, %v1885_v38  ;;  %v1899_v39 = vmul.f32 %v3144_v2, %v1884_v51 }
 0x353   : > { %v1755_v49 = vld [vmem:[#allocation4 + $0x8] sm:$0xff]  ;;  %v1754_v5 = vld [vmem:[#allocation4] sm:$0xff] }
 0x354   : > { %v1883_v20 = vmul.f32 %v1810_v9, %v1755_v49  ;;  %v1882_v54 = vmul.f32 %v1805_v28, %v1754_v5 }
 0x356   : > { %v3192_v7 = vsub.f32 %v1883_v20, %v1900_v13  ;;  %v3194_v37 = vsub.f32 %v1882_v54, %v1899_v39 }
 0x358   : > { %v1915_v26 = vmul.f32 %v3194_v37, %v3194_v37  ;;  %v1916_v57 = vmul.f32 %v3192_v7, %v3192_v7 }
 0x35a   : > { %v1923_v52 = vsel %vm454_vm2, %v1915_v26, 0.0  ;;  %v1926_v10 = vsel %vm454_vm2, %v1916_v57, 0.0 }
 0x35b   : > { %1924 = vadd.xlane.f32.xlu0 %v1923_v52  ;;  %1927 = vadd.xlane.f32.xlu1 %v1926_v10 }
 0x3b7   : > { %v1931_v19 = vpop.xlane.xlu1 %1930 }
 0x3b8   : > { %v1950_v2 = vmul.f32 0.0625, %v1931_v19 }
 0x3ba   : > { %v1958_v24 = vadd.f32 1e-05, %v1950_v2 }
 0x3bc   : > { %2491 = vrsqrt.f32 %v1958_v24 }
 0x3c0   : > { %v1934_v27 = vpop.xlane.xlu0 %1933 }
 0x3c1   : > { %v1951_v43 = vmul.f32 0.0625, %v1934_v27 }
 0x3c3   : > { %v1959_v53 = vadd.f32 1e-05, %v1951_v43 }
 0x3c5   : > { %2493 = vrsqrt.f32 %v1959_v53 }
 0x3c8   : > { %v1937_v58 = vpop.xlane.xlu0 %1936  ;;  %v1940_v17 = vpop.xlane.xlu1 %1939 }
 0x3c9   : > { %v1952_v23 = vmul.f32 0.0625, %v1937_v58  ;;  %v1953_v33 = vmul.f32 0.0625, %v1940_v17  ;;  %v2492_v3 = vpop.eup %2491 }
 0x3ca   : > { %v1974_v25 = vmul.f32 %v2492_v3, %v3147_v50 }
 0x3cb   : > { %v1960_v59 = vadd.f32 1e-05, %v1952_v23  ;;  %v1961_v56 = vadd.f32 1e-05, %v1953_v33 }
 0x3cc   : > { %v1989_v63 = vmul.f32 %v2233_v18, %v1974_v25 }
 0x3cd   : > { %2495 = vrsqrt.f32 %v1960_v59 }
 0x3ce   : > { %2497 = vrsqrt.f32 %v1961_v56 }
 0x3d0   : > { %v1943_v40 = vpop.xlane.xlu0 %1942  ;;  %v1946_v45 = vpop.xlane.xlu1 %1945 }
 0x3d1   : > { %v1954_v12 = vmul.f32 0.0625, %v1943_v40  ;;  %v1955_v16 = vmul.f32 0.0625, %v1946_v45 }
 0x3d2   : > { %v2494_v31 = vpop.eup %2493 }
 0x3d3   : > { %v1962_v35 = vadd.f32 1e-05, %v1954_v12  ;;  %v1963_v42 = vadd.f32 1e-05, %v1955_v16  ;;  %v1975_v15 = vmul.f32 %v2494_v31, %v3153_v48 }
 0x3d5   : > { %2499 = vrsqrt.f32 %v1962_v35  ;;  %v1990_v4 = vmul.f32 %v2233_v18, %v1975_v15 }
 0x3d6   : > { %2501 = vrsqrt.f32 %v1963_v42 }
 0x3d7   : > { %v1996_v21 = vpack.c.bf16 %v1990_v4, %v1989_v63 }
 0x3d9   : > { %2000 = vrot.lane.b32.xlu0 %v1996_v21, %s2535_s12 }
 0x3da   : > { %v2496_v34 = vpop.eup %2495 }
 0x3db   : > { %v2498_v32 = vpop.eup %2497  ;;  %v1976_v50 = vmul.f32 %v2496_v34, %v3162_v44 }
 0x3dc   : > { %v1977_v41 = vmul.f32 %v2498_v32, %v3160_v29 }
 0x3dd   : > { %v1991_v55 = vmul.f32 %v2233_v18, %v1976_v50 }
 0x3de   : > { %v1992_v1 = vmul.f32 %v2233_v18, %v1977_v41 }
 0x3e0   : > { %v1997_v46 = vpack.c.bf16 %v1992_v1, %v1991_v55 }
 0x3e2   : > { %v2500_v0 = vpop.eup %2499  ;;  %2003 = vrot.lane.b32.xlu1 %v1997_v46, %s2536_s13 }
 0x3e3   : > { %v2502_v48 = vpop.eup %2501  ;;  %v1978_v47 = vmul.f32 %v2500_v0, %v3174_v62 }
 0x3e4   : > { %v1979_v6 = vmul.f32 %v2502_v48, %v3172_v30  ;;  %v1925_v11 = vpop.xlane.xlu0 %1924  ;;  %v1928_v44 = vpop.xlane.xlu1 %1927 }
 0x3e5   : > { %v1993_v22 = vmul.f32 %v2233_v18, %v1978_v47  ;;  %v1948_v36 = vmul.f32 0.0625, %v1925_v11  ;;  %v1949_v29 = vmul.f32 0.0625, %v1928_v44 }
 0x3e6   : > { %v1994_v61 = vmul.f32 %v2233_v18, %v1979_v6 }
 0x3e7   : > { %v1956_v60 = vadd.f32 1e-05, %v1948_v36  ;;  %v1957_v14 = vadd.f32 1e-05, %v1949_v29 }
 0x3e8   : > { %v1998_v8 = vpack.c.bf16 %v1994_v61, %v1993_v22 }
 0x3e9   : > { %2503 = vrsqrt.f32 %v1956_v60 }
 0x3ea   : > { %2006 = vrot.lane.b32.xlu1 %v1998_v8, %s2537_s14  ;;  %2505 = vrsqrt.f32 %v1957_v14 }
 0x3f6   : > { %v2504_v38 = vpop.eup %2503 }
 0x3f7   : > { %v2506_v51 = vpop.eup %2505  ;;  %v1972_v62 = vmul.f32 %v2504_v38, %v3194_v37 }
 0x3f8   : > { %v1973_v30 = vmul.f32 %v2506_v51, %v3192_v7 }
 0x3f9   : > { %v1987_v9 = vmul.f32 %v2233_v18, %v1972_v62 }
 0x3fa   : > { %v1988_v49 = vmul.f32 %v2233_v18, %v1973_v30 }
 0x3fc   : > { %v1995_v13 = vpack.c.bf16 %v1988_v49, %v1987_v9 }
 0x44b   : > { %v2001_v28 = vpop.permute.xlu0 %2000 }
 0x44c   : > { %v2010_v39 = vsel %vm454_vm2, %v1995_v13, %v2001_v28 }
 0x454   : > { %v2004_v5 = vpop.permute.xlu1 %2003 }
 0x455   : > { %v2013_v20 = vsel %vm2011_vm4, %v2010_v39, %v2004_v5 }
 0x45c   : > { %v2007_v54 = vpop.permute.xlu1 %2006 }
 0x45d   : > { %v2016_v37 = vsel %vm2014_vm5, %v2013_v20, %v2007_v54 }
 0x45e   : > { %v2234_v26 = vcombine.low %v2016_v37, %v2016_v37  ;;  %v2235_v7 = vcombine.high %v2016_v37, %v2016_v37 }
 0x460   : > { %2025 = vst.msk [vmem:[%s414_s18] sm:$0xf] %vm2024_vm6, %v2234_v26  ;;  %2026 = vst.msk [vmem:[%s414_s18 + $0x4] sm:$0xf] %vm2024_vm6, %v2235_v7 }
 0x461 PF: > { %s16_s22 = sadd.s32 1, %s2529_s22   ;;  %s3248_s20 = smov %s2525_s21 }
 0x462   : > { %p13_p5 = scmp.ge.s32.totalorder %s16_s22, 4   ;;  %s3249_s21 = smov %s3251_s0 }
 0x464   :  { %15 = sbr.rel (!%p13_p5) target bundleno = 2 (0x2), region = 84 }

</bundles_post_ra>
